<compile_context>
chip_gen: v7x
topology: tpu7x:2x2x1
jax: 0.10.0
libtpu: 0.0.40
codegen_flags: <defaults>
</compile_context>

<pallas_src>
import functools

import jax
import jax.numpy as jnp
from jax.experimental import pallas as pl
from jax.experimental.pallas import tpu as pltpu


# ----------------------------- Pallas kernel --------------------------------
def _cnn_chain_kernel(x_ref, *refs, series, num_layers):
    """Fused conv(3,1)/stride2 + BN(eval) + ReLU chain + mean over series.

    x_ref : [series, tn, C_in] bf16 — one block of tn independent rows
    refs  : (w_1, sh_1, ..., w_L, sh_L, o_ref)
            w_l  : [3, C_in_l, C_out_l] bf16 (BN scale folded, tap-major)
            sh_l : [1, C_out_l]         f32  (conv bias + BN shift, folded)
    o_ref : [tn, C_out_last] f32
    """
    o_ref = refs[-1]
    w_refs = [refs[2 * l] for l in range(num_layers)]
    sh_refs = [refs[2 * l + 1] for l in range(num_layers)]

    # Per-`series` activation blocks, each [tn, C], carried in bf16.
    # TODO(synk): for very large `series`, replace this unrolled block list
    # with a VMEM scratch [S, tn, C_max] + lax.fori_loop to bound live ranges.
    blocks = [x_ref[s] for s in range(series)]

    for l in range(num_layers):
        s_in = len(blocks)
        s_out = (s_in - 1) // 2 + 1            # kernel 3, stride 2, pad 1
        w0 = w_refs[l][0]                      # [C_in, C_out] bf16
        w1 = w_refs[l][1]
        w2 = w_refs[l][2]
        shift = sh_refs[l][...]                # [1, C_out] f32
        last = l == num_layers - 1

        new_blocks = []
        for so in range(s_out):
            # Output position so reads input positions (2so-1, 2so, 2so+1);
            # out-of-range taps hit the zero padding -> skip the matmul.
            acc = jnp.dot(blocks[2 * so], w1,
                          preferred_element_type=jnp.float32)
            if 2 * so - 1 >= 0:
                acc = acc + jnp.dot(blocks[2 * so - 1], w0,
                                    preferred_element_type=jnp.float32)
            if 2 * so + 1 < s_in:
                acc = acc + jnp.dot(blocks[2 * so + 1], w2,
                                    preferred_element_type=jnp.float32)
            y = jnp.maximum(acc + shift, 0.0)          # f32 epilogue (BN+ReLU)
            new_blocks.append(y if last else y.astype(jnp.bfloat16))
        blocks = new_blocks

    # AdaptiveAvgPool2d H-direction: mean over remaining series positions (f32).
    pooled = blocks[0]
    for b in blocks[1:]:
        pooled = pooled + b
    o_ref[...] = (pooled * (1.0 / len(blocks))).astype(o_ref.dtype)


# ------------------------------ wrappers -------------------------------------
def _conv_chain_vmem_bytes(series, tn, chans):
    """Conservative per-block VMEM footprint. chans = [C_in, C1, ..., C_last]."""
    cin, couts = chans[0], chans[1:]
    est = 2 * series * tn * cin * 2            # input block, bf16, 2 buffers
    est += 2 * tn * couts[-1] * 4              # output block, f32, 2 buffers
    c_prev = cin
    for c in couts:                            # weights + shifts (2 buffers)
        est += 2 * (3 * c_prev * c * 2 + c * 4)
        c_prev = c
    s, c_prev, act_peak = series, cin, 0       # live activations of one layer
    for i, c in enumerate(couts):
        s_out = (s - 1) // 2 + 1
        out_b = 4 if i == len(couts) - 1 else 2
        act_peak = max(act_peak, s * tn * c_prev * 2 + s_out * tn * c * out_b)
        s, c_prev = s_out, c
    return est + act_peak


def _pick_block_rows(n, series, chans, budget=48 * 1024 * 1024):
    """Largest row block dividing n that fits the VMEM budget."""
    divisors = [t for t in (512, 256, 128, 64, 32, 16, 8) if n % t == 0]
    tn = n
    for cand in divisors:
        if _conv_chain_vmem_bytes(series, cand, chans) <= budget:
            tn = cand
            break
    else:
        if divisors:
            tn = divisors[-1]                  # best effort if budget too tight
    # v7x megacore: if one giant block covers everything, split in two so both
    # TensorCores get work; near-free on single-TC v5e/v6e.
    if n // tn == 1 and n >= 256 and tn % 16 == 0:
        tn //= 2
    return tn


def fused_conv_chain(x_snc, layer_params):
    """x_snc: [series, N, C_in], N = batch*modal. Returns [N, C_last] f32."""
    S, N, Cin = x_snc.shape
    eps = 1e-5
    couts = [int(lp["w"].shape[-1]) for lp in layer_params]
    chans = [int(Cin)] + couts
    tn = _pick_block_rows(N, S, chans)

    operands = [x_snc.astype(jnp.bfloat16)]
    in_specs = [pl.BlockSpec((S, tn, Cin), lambda i: (0, i, 0))]
    for lp in layer_params:
        scale = lp["gamma"] / jnp.sqrt(lp["var"] + eps)            # [C_out]
        # Fold BN scale into the conv weight in f32, then cast once to bf16.
        w = (lp["w"].astype(jnp.float32) * scale[None, None, :]).astype(jnp.bfloat16)
        shift = lp["beta"] + (lp["b"] - lp["mean"]) * scale        # bias+BN shift
        shift = shift.reshape(1, -1).astype(jnp.float32)
        operands += [w, shift]
        # Grid-invariant operands (constant index_map across the grid).
        # TODO(synk): single-buffer via pipeline_mode=pl.Buffered(1) when the
        # deployed JAX supports it; only matters for VMEM headroom at grid > 1.
        in_specs += [pl.BlockSpec(w.shape, lambda i: (0, 0, 0)),
                     pl.BlockSpec(shift.shape, lambda i: (0, 0))]
    c_last = couts[-1]

    cp_kwargs = {}
    est = _conv_chain_vmem_bytes(S, tn, chans)
    if est > 24 * 1024 * 1024:       # above scoped defaults -> raise explicitly
        cp_kwargs["vmem_limit_bytes"] = int(
            min(max(est * 3 // 2, 32 * 1024 * 1024), 56 * 1024 * 1024))

    return pl.pallas_call(
        functools.partial(_cnn_chain_kernel, series=S,
                          num_layers=len(layer_params)),
        out_shape=jax.ShapeDtypeStruct((N, c_last), jnp.float32),
        grid_spec=pltpu.PrefetchScalarGridSpec(
            num_scalar_prefetch=0,
            grid=(N // tn,),
            in_specs=in_specs,
            out_specs=pl.BlockSpec((tn, c_last), lambda i: (i, 0)),
        ),
        compiler_params=pltpu.CompilerParams(
            dimension_semantics=("parallel",), **cp_kwargs),
    )(*operands)


def adaptive_pool_w(feat_bwc, out_w):
    """AdaptiveAvgPool along the modal axis (series axis is pooled in-kernel)."""
    B, W, C = feat_bwc.shape
    if W == out_w:
        return feat_bwc                        # identity (modal == input_length)
    cols = []
    for j in range(out_w):
        ws = (j * W) // out_w
        we = -(-((j + 1) * W) // out_w)
        cols.append(feat_bwc[:, ws:we, :].mean(axis=1))
    return jnp.stack(cols, axis=1)             # [B, out_w, C]


def cnn_forward(x, params, input_length):
    """x: [b, c, series, modal] (NCHW, like the PyTorch module)."""
    if x.ndim == 3:
        x = x[:, :, None, :]
    B, C, S, W = x.shape
    # [B, C, S, W] -> [S, B*W, C]: every (batch, modal) column is one row.
    xs = jnp.transpose(x, (2, 0, 3, 1)).reshape(S, B * W, C)
    feat = fused_conv_chain(xs, params["convs"])           # [B*W, 512] f32
    feat = feat.reshape(B, W, -1)                          # [B, W, 512]
    pooled = adaptive_pool_w(feat, input_length)           # [B, L, 512]
    # torch .view(B, -1) order on [B, 512, 1, L]: channel-major, L-minor.
    flat = jnp.transpose(pooled, (0, 2, 1)).reshape(B, -1)
    # FC is M=batch x N=num_classes: far below Pallas launch overhead -> XLA dot.
    return jnp.dot(flat, params["fc_w"],
                   preferred_element_type=jnp.float32) + params["fc_b"]


# --------------------------- deterministic init ------------------------------
def init_params(key, num_input_channels, num_classes, input_length):
    chans = [num_input_channels, 64, 128, 256, 512]
    keys = jax.random.split(key, 2 * (len(chans) - 1) + 2)
    convs = []
    for li in range(len(chans) - 1):
        cin, cout = chans[li], chans[li + 1]
        w = 0.05 * jax.random.normal(keys[2 * li], (3, cin, cout), jnp.float32)
        b = 0.05 * jax.random.normal(keys[2 * li + 1], (cout,), jnp.float32)
        convs.append(dict(
            w=w, b=b,
            gamma=jnp.ones((cout,), jnp.float32),
            beta=jnp.zeros((cout,), jnp.float32),
            mean=jnp.zeros((cout,), jnp.float32),
            var=jnp.ones((cout,), jnp.float32),
        ))
    fc_in = 512 * input_length
    fc_w = 0.05 * jax.random.normal(keys[-2], (fc_in, num_classes), jnp.float32)
    fc_b = 0.05 * jax.random.normal(keys[-1], (num_classes,), jnp.float32)
    return dict(convs=convs, fc_w=fc_w, fc_b=fc_b)


if __name__ == "__main__":
    num_input_channels, num_classes, input_length = 4, 5, 8
    batch, series = 2, 16
    key = jax.random.PRNGKey(0)
    kx, kp = jax.random.split(key)
    # x: [b, c, series, modal]; modal == input_length so the fc shape works out.
    x = jax.random.normal(kx, (batch, num_input_channels, series, input_length),
                          jnp.float32)
    params = init_params(kp, num_input_channels, num_classes, input_length)
    fwd = jax.jit(lambda xx, pp: cnn_forward(xx, pp, input_length))
    out = jax.block_until_ready(fwd(x, params))
    assert out.shape == (batch, num_classes)
    print("KERNEL_OK")
</pallas_src>

<mosaic_0001>
module attributes {stable_mosaic.version = 11 : i64} {
  func.func @_cnn_chain_kernel(%arg0: i32, %arg1: memref<16x16x4xbf16, #tpu.memory_space<vmem>>, %arg2: memref<3x4x64xbf16, #tpu.memory_space<vmem>>, %arg3: memref<1x64xf32, #tpu.memory_space<vmem>>, %arg4: memref<3x64x128xbf16, #tpu.memory_space<vmem>>, %arg5: memref<1x128xf32, #tpu.memory_space<vmem>>, %arg6: memref<3x128x256xbf16, #tpu.memory_space<vmem>>, %arg7: memref<1x256xf32, #tpu.memory_space<vmem>>, %arg8: memref<3x256x512xbf16, #tpu.memory_space<vmem>>, %arg9: memref<1x512xf32, #tpu.memory_space<vmem>>, %arg10: memref<16x512xf32, #tpu.memory_space<vmem>>) attributes {dimension_semantics = [#tpu.dimension_semantics<parallel>], iteration_bounds = array<i64: 1>, scalar_prefetch = 0 : i64, scratch_operands = 0 : i64, tpu.core_type = #tpu.core_type<tc>, window_params = [{transform_indices = @transform_0, window_bounds = array<i64: 16, 16, 4>}, {pipeline_mode = #tpu.pipeline_mode<synchronous>, transform_indices = @transform_1, window_bounds = array<i64: 3, 4, 64>}, {pipeline_mode = #tpu.pipeline_mode<synchronous>, transform_indices = @transform_2, window_bounds = array<i64: 1, 64>}, {pipeline_mode = #tpu.pipeline_mode<synchronous>, transform_indices = @transform_3, window_bounds = array<i64: 3, 64, 128>}, {pipeline_mode = #tpu.pipeline_mode<synchronous>, transform_indices = @transform_4, window_bounds = array<i64: 1, 128>}, {pipeline_mode = #tpu.pipeline_mode<synchronous>, transform_indices = @transform_5, window_bounds = array<i64: 3, 128, 256>}, {pipeline_mode = #tpu.pipeline_mode<synchronous>, transform_indices = @transform_6, window_bounds = array<i64: 1, 256>}, {pipeline_mode = #tpu.pipeline_mode<synchronous>, transform_indices = @transform_7, window_bounds = array<i64: 3, 256, 512>}, {pipeline_mode = #tpu.pipeline_mode<synchronous>, transform_indices = @transform_8, window_bounds = array<i64: 1, 512>}, {transform_indices = @transform_9, window_bounds = array<i64: 16, 512>}]} {
    %c0 = arith.constant 0 : index
    %c0_0 = arith.constant 0 : index
    %c0_1 = arith.constant 0 : index
    %0 = vector.load %arg1[%c0, %c0_0, %c0_1] : memref<16x16x4xbf16, #tpu.memory_space<vmem>>, vector<1x16x4xbf16>
    %1 = vector.shape_cast %0 : vector<1x16x4xbf16> to vector<16x4xbf16>
    %c1 = arith.constant 1 : index
    %c0_2 = arith.constant 0 : index
    %c0_3 = arith.constant 0 : index
    %2 = vector.load %arg1[%c1, %c0_2, %c0_3] : memref<16x16x4xbf16, #tpu.memory_space<vmem>>, vector<1x16x4xbf16>
    %3 = vector.shape_cast %2 : vector<1x16x4xbf16> to vector<16x4xbf16>
    %c2 = arith.constant 2 : index
    %c0_4 = arith.constant 0 : index
    %c0_5 = arith.constant 0 : index
    %4 = vector.load %arg1[%c2, %c0_4, %c0_5] : memref<16x16x4xbf16, #tpu.memory_space<vmem>>, vector<1x16x4xbf16>
    %5 = vector.shape_cast %4 : vector<1x16x4xbf16> to vector<16x4xbf16>
    %c3 = arith.constant 3 : index
    %c0_6 = arith.constant 0 : index
    %c0_7 = arith.constant 0 : index
    %6 = vector.load %arg1[%c3, %c0_6, %c0_7] : memref<16x16x4xbf16, #tpu.memory_space<vmem>>, vector<1x16x4xbf16>
    %7 = vector.shape_cast %6 : vector<1x16x4xbf16> to vector<16x4xbf16>
    %c4 = arith.constant 4 : index
    %c0_8 = arith.constant 0 : index
    %c0_9 = arith.constant 0 : index
    %8 = vector.load %arg1[%c4, %c0_8, %c0_9] : memref<16x16x4xbf16, #tpu.memory_space<vmem>>, vector<1x16x4xbf16>
    %9 = vector.shape_cast %8 : vector<1x16x4xbf16> to vector<16x4xbf16>
    %c5 = arith.constant 5 : index
    %c0_10 = arith.constant 0 : index
    %c0_11 = arith.constant 0 : index
    %10 = vector.load %arg1[%c5, %c0_10, %c0_11] : memref<16x16x4xbf16, #tpu.memory_space<vmem>>, vector<1x16x4xbf16>
    %11 = vector.shape_cast %10 : vector<1x16x4xbf16> to vector<16x4xbf16>
    %c6 = arith.constant 6 : index
    %c0_12 = arith.constant 0 : index
    %c0_13 = arith.constant 0 : index
    %12 = vector.load %arg1[%c6, %c0_12, %c0_13] : memref<16x16x4xbf16, #tpu.memory_space<vmem>>, vector<1x16x4xbf16>
    %13 = vector.shape_cast %12 : vector<1x16x4xbf16> to vector<16x4xbf16>
    %c7 = arith.constant 7 : index
    %c0_14 = arith.constant 0 : index
    %c0_15 = arith.constant 0 : index
    %14 = vector.load %arg1[%c7, %c0_14, %c0_15] : memref<16x16x4xbf16, #tpu.memory_space<vmem>>, vector<1x16x4xbf16>
    %15 = vector.shape_cast %14 : vector<1x16x4xbf16> to vector<16x4xbf16>
    %c8 = arith.constant 8 : index
    %c0_16 = arith.constant 0 : index
    %c0_17 = arith.constant 0 : index
    %16 = vector.load %arg1[%c8, %c0_16, %c0_17] : memref<16x16x4xbf16, #tpu.memory_space<vmem>>, vector<1x16x4xbf16>
    %17 = vector.shape_cast %16 : vector<1x16x4xbf16> to vector<16x4xbf16>
    %c9 = arith.constant 9 : index
    %c0_18 = arith.constant 0 : index
    %c0_19 = arith.constant 0 : index
    %18 = vector.load %arg1[%c9, %c0_18, %c0_19] : memref<16x16x4xbf16, #tpu.memory_space<vmem>>, vector<1x16x4xbf16>
    %19 = vector.shape_cast %18 : vector<1x16x4xbf16> to vector<16x4xbf16>
    %c10 = arith.constant 10 : index
    %c0_20 = arith.constant 0 : index
    %c0_21 = arith.constant 0 : index
    %20 = vector.load %arg1[%c10, %c0_20, %c0_21] : memref<16x16x4xbf16, #tpu.memory_space<vmem>>, vector<1x16x4xbf16>
    %21 = vector.shape_cast %20 : vector<1x16x4xbf16> to vector<16x4xbf16>
    %c11 = arith.constant 11 : index
    %c0_22 = arith.constant 0 : index
    %c0_23 = arith.constant 0 : index
    %22 = vector.load %arg1[%c11, %c0_22, %c0_23] : memref<16x16x4xbf16, #tpu.memory_space<vmem>>, vector<1x16x4xbf16>
    %23 = vector.shape_cast %22 : vector<1x16x4xbf16> to vector<16x4xbf16>
    %c12 = arith.constant 12 : index
    %c0_24 = arith.constant 0 : index
    %c0_25 = arith.constant 0 : index
    %24 = vector.load %arg1[%c12, %c0_24, %c0_25] : memref<16x16x4xbf16, #tpu.memory_space<vmem>>, vector<1x16x4xbf16>
    %25 = vector.shape_cast %24 : vector<1x16x4xbf16> to vector<16x4xbf16>
    %c13 = arith.constant 13 : index
    %c0_26 = arith.constant 0 : index
    %c0_27 = arith.constant 0 : index
    %26 = vector.load %arg1[%c13, %c0_26, %c0_27] : memref<16x16x4xbf16, #tpu.memory_space<vmem>>, vector<1x16x4xbf16>
    %27 = vector.shape_cast %26 : vector<1x16x4xbf16> to vector<16x4xbf16>
    %c14 = arith.constant 14 : index
    %c0_28 = arith.constant 0 : index
    %c0_29 = arith.constant 0 : index
    %28 = vector.load %arg1[%c14, %c0_28, %c0_29] : memref<16x16x4xbf16, #tpu.memory_space<vmem>>, vector<1x16x4xbf16>
    %29 = vector.shape_cast %28 : vector<1x16x4xbf16> to vector<16x4xbf16>
    %c15 = arith.constant 15 : index
    %c0_30 = arith.constant 0 : index
    %c0_31 = arith.constant 0 : index
    %30 = vector.load %arg1[%c15, %c0_30, %c0_31] : memref<16x16x4xbf16, #tpu.memory_space<vmem>>, vector<1x16x4xbf16>
    %31 = vector.shape_cast %30 : vector<1x16x4xbf16> to vector<16x4xbf16>
    %c0_32 = arith.constant 0 : index
    %c0_33 = arith.constant 0 : index
    %c0_34 = arith.constant 0 : index
    %32 = vector.load %arg2[%c0_32, %c0_33, %c0_34] : memref<3x4x64xbf16, #tpu.memory_space<vmem>>, vector<1x4x64xbf16>
    %33 = vector.shape_cast %32 : vector<1x4x64xbf16> to vector<4x64xbf16>
    %c1_35 = arith.constant 1 : index
    %c0_36 = arith.constant 0 : index
    %c0_37 = arith.constant 0 : index
    %34 = vector.load %arg2[%c1_35, %c0_36, %c0_37] : memref<3x4x64xbf16, #tpu.memory_space<vmem>>, vector<1x4x64xbf16>
    %35 = vector.shape_cast %34 : vector<1x4x64xbf16> to vector<4x64xbf16>
    %c2_38 = arith.constant 2 : index
    %c0_39 = arith.constant 0 : index
    %c0_40 = arith.constant 0 : index
    %36 = vector.load %arg2[%c2_38, %c0_39, %c0_40] : memref<3x4x64xbf16, #tpu.memory_space<vmem>>, vector<1x4x64xbf16>
    %37 = vector.shape_cast %36 : vector<1x4x64xbf16> to vector<4x64xbf16>
    %c0_41 = arith.constant 0 : index
    %c0_42 = arith.constant 0 : index
    %38 = vector.load %arg3[%c0_41, %c0_42] : memref<1x64xf32, #tpu.memory_space<vmem>>, vector<1x64xf32>
    %cst = arith.constant dense<0.000000e+00> : vector<16x64xf32>
    %39 = tpu.matmul %1, %35, %cst {dimension_numbers = #tpu.dot_dimension_numbers<[1], [0], [0], [1], [0, 0, 1, 1], [], []>} : vector<16x4xbf16>, vector<4x64xbf16>, vector<16x64xf32> -> vector<16x64xf32>
    %cst_43 = arith.constant dense<0.000000e+00> : vector<16x64xf32>
    %40 = tpu.matmul %3, %37, %cst_43 {dimension_numbers = #tpu.dot_dimension_numbers<[1], [0], [0], [1], [0, 0, 1, 1], [], []>} : vector<16x4xbf16>, vector<4x64xbf16>, vector<16x64xf32> -> vector<16x64xf32>
    %41 = arith.addf %39, %40 : vector<16x64xf32>
    %42 = vector.broadcast %38 : vector<1x64xf32> to vector<16x64xf32>
    %43 = arith.addf %41, %42 : vector<16x64xf32>
    %cst_44 = arith.constant 0.000000e+00 : f32
    %44 = vector.broadcast %cst_44 : f32 to vector<16x64xf32>
    %45 = arith.maximumf %43, %44 : vector<16x64xf32>
    %46 = arith.truncf %45 : vector<16x64xf32> to vector<16x64xbf16>
    %cst_45 = arith.constant dense<0.000000e+00> : vector<16x64xf32>
    %47 = tpu.matmul %5, %35, %cst_45 {dimension_numbers = #tpu.dot_dimension_numbers<[1], [0], [0], [1], [0, 0, 1, 1], [], []>} : vector<16x4xbf16>, vector<4x64xbf16>, vector<16x64xf32> -> vector<16x64xf32>
    %cst_46 = arith.constant dense<0.000000e+00> : vector<16x64xf32>
    %48 = tpu.matmul %3, %33, %cst_46 {dimension_numbers = #tpu.dot_dimension_numbers<[1], [0], [0], [1], [0, 0, 1, 1], [], []>} : vector<16x4xbf16>, vector<4x64xbf16>, vector<16x64xf32> -> vector<16x64xf32>
    %49 = arith.addf %47, %48 : vector<16x64xf32>
    %cst_47 = arith.constant dense<0.000000e+00> : vector<16x64xf32>
    %50 = tpu.matmul %7, %37, %cst_47 {dimension_numbers = #tpu.dot_dimension_numbers<[1], [0], [0], [1], [0, 0, 1, 1], [], []>} : vector<16x4xbf16>, vector<4x64xbf16>, vector<16x64xf32> -> vector<16x64xf32>
    %51 = arith.addf %49, %50 : vector<16x64xf32>
    %52 = vector.broadcast %38 : vector<1x64xf32> to vector<16x64xf32>
    %53 = arith.addf %51, %52 : vector<16x64xf32>
    %cst_48 = arith.constant 0.000000e+00 : f32
    %54 = vector.broadcast %cst_48 : f32 to vector<16x64xf32>
    %55 = arith.maximumf %53, %54 : vector<16x64xf32>
    %56 = arith.truncf %55 : vector<16x64xf32> to vector<16x64xbf16>
    %cst_49 = arith.constant dense<0.000000e+00> : vector<16x64xf32>
    %57 = tpu.matmul %9, %35, %cst_49 {dimension_numbers = #tpu.dot_dimension_numbers<[1], [0], [0], [1], [0, 0, 1, 1], [], []>} : vector<16x4xbf16>, vector<4x64xbf16>, vector<16x64xf32> -> vector<16x64xf32>
    %cst_50 = arith.constant dense<0.000000e+00> : vector<16x64xf32>
    %58 = tpu.matmul %7, %33, %cst_50 {dimension_numbers = #tpu.dot_dimension_numbers<[1], [0], [0], [1], [0, 0, 1, 1], [], []>} : vector<16x4xbf16>, vector<4x64xbf16>, vector<16x64xf32> -> vector<16x64xf32>
    %59 = arith.addf %57, %58 : vector<16x64xf32>
    %cst_51 = arith.constant dense<0.000000e+00> : vector<16x64xf32>
    %60 = tpu.matmul %11, %37, %cst_51 {dimension_numbers = #tpu.dot_dimension_numbers<[1], [0], [0], [1], [0, 0, 1, 1], [], []>} : vector<16x4xbf16>, vector<4x64xbf16>, vector<16x64xf32> -> vector<16x64xf32>
    %61 = arith.addf %59, %60 : vector<16x64xf32>
    %62 = vector.broadcast %38 : vector<1x64xf32> to vector<16x64xf32>
    %63 = arith.addf %61, %62 : vector<16x64xf32>
    %cst_52 = arith.constant 0.000000e+00 : f32
    %64 = vector.broadcast %cst_52 : f32 to vector<16x64xf32>
    %65 = arith.maximumf %63, %64 : vector<16x64xf32>
    %66 = arith.truncf %65 : vector<16x64xf32> to vector<16x64xbf16>
    %cst_53 = arith.constant dense<0.000000e+00> : vector<16x64xf32>
    %67 = tpu.matmul %13, %35, %cst_53 {dimension_numbers = #tpu.dot_dimension_numbers<[1], [0], [0], [1], [0, 0, 1, 1], [], []>} : vector<16x4xbf16>, vector<4x64xbf16>, vector<16x64xf32> -> vector<16x64xf32>
    %cst_54 = arith.constant dense<0.000000e+00> : vector<16x64xf32>
    %68 = tpu.matmul %11, %33, %cst_54 {dimension_numbers = #tpu.dot_dimension_numbers<[1], [0], [0], [1], [0, 0, 1, 1], [], []>} : vector<16x4xbf16>, vector<4x64xbf16>, vector<16x64xf32> -> vector<16x64xf32>
    %69 = arith.addf %67, %68 : vector<16x64xf32>
    %cst_55 = arith.constant dense<0.000000e+00> : vector<16x64xf32>
    %70 = tpu.matmul %15, %37, %cst_55 {dimension_numbers = #tpu.dot_dimension_numbers<[1], [0], [0], [1], [0, 0, 1, 1], [], []>} : vector<16x4xbf16>, vector<4x64xbf16>, vector<16x64xf32> -> vector<16x64xf32>
    %71 = arith.addf %69, %70 : vector<16x64xf32>
    %72 = vector.broadcast %38 : vector<1x64xf32> to vector<16x64xf32>
    %73 = arith.addf %71, %72 : vector<16x64xf32>
    %cst_56 = arith.constant 0.000000e+00 : f32
    %74 = vector.broadcast %cst_56 : f32 to vector<16x64xf32>
    %75 = arith.maximumf %73, %74 : vector<16x64xf32>
    %76 = arith.truncf %75 : vector<16x64xf32> to vector<16x64xbf16>
    %cst_57 = arith.constant dense<0.000000e+00> : vector<16x64xf32>
    %77 = tpu.matmul %17, %35, %cst_57 {dimension_numbers = #tpu.dot_dimension_numbers<[1], [0], [0], [1], [0, 0, 1, 1], [], []>} : vector<16x4xbf16>, vector<4x64xbf16>, vector<16x64xf32> -> vector<16x64xf32>
    %cst_58 = arith.constant dense<0.000000e+00> : vector<16x64xf32>
    %78 = tpu.matmul %15, %33, %cst_58 {dimension_numbers = #tpu.dot_dimension_numbers<[1], [0], [0], [1], [0, 0, 1, 1], [], []>} : vector<16x4xbf16>, vector<4x64xbf16>, vector<16x64xf32> -> vector<16x64xf32>
    %79 = arith.addf %77, %78 : vector<16x64xf32>
    %cst_59 = arith.constant dense<0.000000e+00> : vector<16x64xf32>
    %80 = tpu.matmul %19, %37, %cst_59 {dimension_numbers = #tpu.dot_dimension_numbers<[1], [0], [0], [1], [0, 0, 1, 1], [], []>} : vector<16x4xbf16>, vector<4x64xbf16>, vector<16x64xf32> -> vector<16x64xf32>
    %81 = arith.addf %79, %80 : vector<16x64xf32>
    %82 = vector.broadcast %38 : vector<1x64xf32> to vector<16x64xf32>
    %83 = arith.addf %81, %82 : vector<16x64xf32>
    %cst_60 = arith.constant 0.000000e+00 : f32
    %84 = vector.broadcast %cst_60 : f32 to vector<16x64xf32>
    %85 = arith.maximumf %83, %84 : vector<16x64xf32>
    %86 = arith.truncf %85 : vector<16x64xf32> to vector<16x64xbf16>
    %cst_61 = arith.constant dense<0.000000e+00> : vector<16x64xf32>
    %87 = tpu.matmul %21, %35, %cst_61 {dimension_numbers = #tpu.dot_dimension_numbers<[1], [0], [0], [1], [0, 0, 1, 1], [], []>} : vector<16x4xbf16>, vector<4x64xbf16>, vector<16x64xf32> -> vector<16x64xf32>
    %cst_62 = arith.constant dense<0.000000e+00> : vector<16x64xf32>
    %88 = tpu.matmul %19, %33, %cst_62 {dimension_numbers = #tpu.dot_dimension_numbers<[1], [0], [0], [1], [0, 0, 1, 1], [], []>} : vector<16x4xbf16>, vector<4x64xbf16>, vector<16x64xf32> -> vector<16x64xf32>
    %89 = arith.addf %87, %88 : vector<16x64xf32>
    %cst_63 = arith.constant dense<0.000000e+00> : vector<16x64xf32>
    %90 = tpu.matmul %23, %37, %cst_63 {dimension_numbers = #tpu.dot_dimension_numbers<[1], [0], [0], [1], [0, 0, 1, 1], [], []>} : vector<16x4xbf16>, vector<4x64xbf16>, vector<16x64xf32> -> vector<16x64xf32>
    %91 = arith.addf %89, %90 : vector<16x64xf32>
    %92 = vector.broadcast %38 : vector<1x64xf32> to vector<16x64xf32>
    %93 = arith.addf %91, %92 : vector<16x64xf32>
    %cst_64 = arith.constant 0.000000e+00 : f32
    %94 = vector.broadcast %cst_64 : f32 to vector<16x64xf32>
    %95 = arith.maximumf %93, %94 : vector<16x64xf32>
    %96 = arith.truncf %95 : vector<16x64xf32> to vector<16x64xbf16>
    %cst_65 = arith.constant dense<0.000000e+00> : vector<16x64xf32>
    %97 = tpu.matmul %25, %35, %cst_65 {dimension_numbers = #tpu.dot_dimension_numbers<[1], [0], [0], [1], [0, 0, 1, 1], [], []>} : vector<16x4xbf16>, vector<4x64xbf16>, vector<16x64xf32> -> vector<16x64xf32>
    %cst_66 = arith.constant dense<0.000000e+00> : vector<16x64xf32>
    %98 = tpu.matmul %23, %33, %cst_66 {dimension_numbers = #tpu.dot_dimension_numbers<[1], [0], [0], [1], [0, 0, 1, 1], [], []>} : vector<16x4xbf16>, vector<4x64xbf16>, vector<16x64xf32> -> vector<16x64xf32>
    %99 = arith.addf %97, %98 : vector<16x64xf32>
    %cst_67 = arith.constant dense<0.000000e+00> : vector<16x64xf32>
    %100 = tpu.matmul %27, %37, %cst_67 {dimension_numbers = #tpu.dot_dimension_numbers<[1], [0], [0], [1], [0, 0, 1, 1], [], []>} : vector<16x4xbf16>, vector<4x64xbf16>, vector<16x64xf32> -> vector<16x64xf32>
    %101 = arith.addf %99, %100 : vector<16x64xf32>
    %102 = vector.broadcast %38 : vector<1x64xf32> to vector<16x64xf32>
    %103 = arith.addf %101, %102 : vector<16x64xf32>
    %cst_68 = arith.constant 0.000000e+00 : f32
    %104 = vector.broadcast %cst_68 : f32 to vector<16x64xf32>
    %105 = arith.maximumf %103, %104 : vector<16x64xf32>
    %106 = arith.truncf %105 : vector<16x64xf32> to vector<16x64xbf16>
    %cst_69 = arith.constant dense<0.000000e+00> : vector<16x64xf32>
    %107 = tpu.matmul %29, %35, %cst_69 {dimension_numbers = #tpu.dot_dimension_numbers<[1], [0], [0], [1], [0, 0, 1, 1], [], []>} : vector<16x4xbf16>, vector<4x64xbf16>, vector<16x64xf32> -> vector<16x64xf32>
    %cst_70 = arith.constant dense<0.000000e+00> : vector<16x64xf32>
    %108 = tpu.matmul %27, %33, %cst_70 {dimension_numbers = #tpu.dot_dimension_numbers<[1], [0], [0], [1], [0, 0, 1, 1], [], []>} : vector<16x4xbf16>, vector<4x64xbf16>, vector<16x64xf32> -> vector<16x64xf32>
    %109 = arith.addf %107, %108 : vector<16x64xf32>
    %cst_71 = arith.constant dense<0.000000e+00> : vector<16x64xf32>
    %110 = tpu.matmul %31, %37, %cst_71 {dimension_numbers = #tpu.dot_dimension_numbers<[1], [0], [0], [1], [0, 0, 1, 1], [], []>} : vector<16x4xbf16>, vector<4x64xbf16>, vector<16x64xf32> -> vector<16x64xf32>
    %111 = arith.addf %109, %110 : vector<16x64xf32>
    %112 = vector.broadcast %38 : vector<1x64xf32> to vector<16x64xf32>
    %113 = arith.addf %111, %112 : vector<16x64xf32>
    %cst_72 = arith.constant 0.000000e+00 : f32
    %114 = vector.broadcast %cst_72 : f32 to vector<16x64xf32>
    %115 = arith.maximumf %113, %114 : vector<16x64xf32>
    %116 = arith.truncf %115 : vector<16x64xf32> to vector<16x64xbf16>
    %c0_73 = arith.constant 0 : index
    %c0_74 = arith.constant 0 : index
    %c0_75 = arith.constant 0 : index
    %117 = vector.load %arg4[%c0_73, %c0_74, %c0_75] : memref<3x64x128xbf16, #tpu.memory_space<vmem>>, vector<1x64x128xbf16>
    %118 = vector.shape_cast %117 : vector<1x64x128xbf16> to vector<64x128xbf16>
    %c1_76 = arith.constant 1 : index
    %c0_77 = arith.constant 0 : index
    %c0_78 = arith.constant 0 : index
    %119 = vector.load %arg4[%c1_76, %c0_77, %c0_78] : memref<3x64x128xbf16, #tpu.memory_space<vmem>>, vector<1x64x128xbf16>
    %120 = vector.shape_cast %119 : vector<1x64x128xbf16> to vector<64x128xbf16>
    %c2_79 = arith.constant 2 : index
    %c0_80 = arith.constant 0 : index
    %c0_81 = arith.constant 0 : index
    %121 = vector.load %arg4[%c2_79, %c0_80, %c0_81] : memref<3x64x128xbf16, #tpu.memory_space<vmem>>, vector<1x64x128xbf16>
    %122 = vector.shape_cast %121 : vector<1x64x128xbf16> to vector<64x128xbf16>
    %c0_82 = arith.constant 0 : index
    %c0_83 = arith.constant 0 : index
    %123 = vector.load %arg5[%c0_82, %c0_83] : memref<1x128xf32, #tpu.memory_space<vmem>>, vector<1x128xf32>
    %cst_84 = arith.constant dense<0.000000e+00> : vector<16x128xf32>
    %124 = tpu.matmul %46, %120, %cst_84 {dimension_numbers = #tpu.dot_dimension_numbers<[1], [0], [0], [1], [0, 0, 1, 1], [], []>} : vector<16x64xbf16>, vector<64x128xbf16>, vector<16x128xf32> -> vector<16x128xf32>
    %cst_85 = arith.constant dense<0.000000e+00> : vector<16x128xf32>
    %125 = tpu.matmul %56, %122, %cst_85 {dimension_numbers = #tpu.dot_dimension_numbers<[1], [0], [0], [1], [0, 0, 1, 1], [], []>} : vector<16x64xbf16>, vector<64x128xbf16>, vector<16x128xf32> -> vector<16x128xf32>
    %126 = arith.addf %124, %125 : vector<16x128xf32>
    %127 = vector.broadcast %123 : vector<1x128xf32> to vector<16x128xf32>
    %128 = arith.addf %126, %127 : vector<16x128xf32>
    %cst_86 = arith.constant 0.000000e+00 : f32
    %129 = vector.broadcast %cst_86 : f32 to vector<16x128xf32>
    %130 = arith.maximumf %128, %129 : vector<16x128xf32>
    %131 = arith.truncf %130 : vector<16x128xf32> to vector<16x128xbf16>
    %cst_87 = arith.constant dense<0.000000e+00> : vector<16x128xf32>
    %132 = tpu.matmul %66, %120, %cst_87 {dimension_numbers = #tpu.dot_dimension_numbers<[1], [0], [0], [1], [0, 0, 1, 1], [], []>} : vector<16x64xbf16>, vector<64x128xbf16>, vector<16x128xf32> -> vector<16x128xf32>
    %cst_88 = arith.constant dense<0.000000e+00> : vector<16x128xf32>
    %133 = tpu.matmul %56, %118, %cst_88 {dimension_numbers = #tpu.dot_dimension_numbers<[1], [0], [0], [1], [0, 0, 1, 1], [], []>} : vector<16x64xbf16>, vector<64x128xbf16>, vector<16x128xf32> -> vector<16x128xf32>
    %134 = arith.addf %132, %133 : vector<16x128xf32>
    %cst_89 = arith.constant dense<0.000000e+00> : vector<16x128xf32>
    %135 = tpu.matmul %76, %122, %cst_89 {dimension_numbers = #tpu.dot_dimension_numbers<[1], [0], [0], [1], [0, 0, 1, 1], [], []>} : vector<16x64xbf16>, vector<64x128xbf16>, vector<16x128xf32> -> vector<16x128xf32>
    %136 = arith.addf %134, %135 : vector<16x128xf32>
    %137 = vector.broadcast %123 : vector<1x128xf32> to vector<16x128xf32>
    %138 = arith.addf %136, %137 : vector<16x128xf32>
    %cst_90 = arith.constant 0.000000e+00 : f32
    %139 = vector.broadcast %cst_90 : f32 to vector<16x128xf32>
    %140 = arith.maximumf %138, %139 : vector<16x128xf32>
    %141 = arith.truncf %140 : vector<16x128xf32> to vector<16x128xbf16>
    %cst_91 = arith.constant dense<0.000000e+00> : vector<16x128xf32>
    %142 = tpu.matmul %86, %120, %cst_91 {dimension_numbers = #tpu.dot_dimension_numbers<[1], [0], [0], [1], [0, 0, 1, 1], [], []>} : vector<16x64xbf16>, vector<64x128xbf16>, vector<16x128xf32> -> vector<16x128xf32>
    %cst_92 = arith.constant dense<0.000000e+00> : vector<16x128xf32>
    %143 = tpu.matmul %76, %118, %cst_92 {dimension_numbers = #tpu.dot_dimension_numbers<[1], [0], [0], [1], [0, 0, 1, 1], [], []>} : vector<16x64xbf16>, vector<64x128xbf16>, vector<16x128xf32> -> vector<16x128xf32>
    %144 = arith.addf %142, %143 : vector<16x128xf32>
    %cst_93 = arith.constant dense<0.000000e+00> : vector<16x128xf32>
    %145 = tpu.matmul %96, %122, %cst_93 {dimension_numbers = #tpu.dot_dimension_numbers<[1], [0], [0], [1], [0, 0, 1, 1], [], []>} : vector<16x64xbf16>, vector<64x128xbf16>, vector<16x128xf32> -> vector<16x128xf32>
    %146 = arith.addf %144, %145 : vector<16x128xf32>
    %147 = vector.broadcast %123 : vector<1x128xf32> to vector<16x128xf32>
    %148 = arith.addf %146, %147 : vector<16x128xf32>
    %cst_94 = arith.constant 0.000000e+00 : f32
    %149 = vector.broadcast %cst_94 : f32 to vector<16x128xf32>
    %150 = arith.maximumf %148, %149 : vector<16x128xf32>
    %151 = arith.truncf %150 : vector<16x128xf32> to vector<16x128xbf16>
    %cst_95 = arith.constant dense<0.000000e+00> : vector<16x128xf32>
    %152 = tpu.matmul %106, %120, %cst_95 {dimension_numbers = #tpu.dot_dimension_numbers<[1], [0], [0], [1], [0, 0, 1, 1], [], []>} : vector<16x64xbf16>, vector<64x128xbf16>, vector<16x128xf32> -> vector<16x128xf32>
    %cst_96 = arith.constant dense<0.000000e+00> : vector<16x128xf32>
    %153 = tpu.matmul %96, %118, %cst_96 {dimension_numbers = #tpu.dot_dimension_numbers<[1], [0], [0], [1], [0, 0, 1, 1], [], []>} : vector<16x64xbf16>, vector<64x128xbf16>, vector<16x128xf32> -> vector<16x128xf32>
    %154 = arith.addf %152, %153 : vector<16x128xf32>
    %cst_97 = arith.constant dense<0.000000e+00> : vector<16x128xf32>
    %155 = tpu.matmul %116, %122, %cst_97 {dimension_numbers = #tpu.dot_dimension_numbers<[1], [0], [0], [1], [0, 0, 1, 1], [], []>} : vector<16x64xbf16>, vector<64x128xbf16>, vector<16x128xf32> -> vector<16x128xf32>
    %156 = arith.addf %154, %155 : vector<16x128xf32>
    %157 = vector.broadcast %123 : vector<1x128xf32> to vector<16x128xf32>
    %158 = arith.addf %156, %157 : vector<16x128xf32>
    %cst_98 = arith.constant 0.000000e+00 : f32
    %159 = vector.broadcast %cst_98 : f32 to vector<16x128xf32>
    %160 = arith.maximumf %158, %159 : vector<16x128xf32>
    %161 = arith.truncf %160 : vector<16x128xf32> to vector<16x128xbf16>
    %c0_99 = arith.constant 0 : index
    %c0_100 = arith.constant 0 : index
    %c0_101 = arith.constant 0 : index
    %162 = vector.load %arg6[%c0_99, %c0_100, %c0_101] : memref<3x128x256xbf16, #tpu.memory_space<vmem>>, vector<1x128x256xbf16>
    %163 = vector.shape_cast %162 : vector<1x128x256xbf16> to vector<128x256xbf16>
    %c1_102 = arith.constant 1 : index
    %c0_103 = arith.constant 0 : index
    %c0_104 = arith.constant 0 : index
    %164 = vector.load %arg6[%c1_102, %c0_103, %c0_104] : memref<3x128x256xbf16, #tpu.memory_space<vmem>>, vector<1x128x256xbf16>
    %165 = vector.shape_cast %164 : vector<1x128x256xbf16> to vector<128x256xbf16>
    %c2_105 = arith.constant 2 : index
    %c0_106 = arith.constant 0 : index
    %c0_107 = arith.constant 0 : index
    %166 = vector.load %arg6[%c2_105, %c0_106, %c0_107] : memref<3x128x256xbf16, #tpu.memory_space<vmem>>, vector<1x128x256xbf16>
    %167 = vector.shape_cast %166 : vector<1x128x256xbf16> to vector<128x256xbf16>
    %c0_108 = arith.constant 0 : index
    %c0_109 = arith.constant 0 : index
    %168 = vector.load %arg7[%c0_108, %c0_109] : memref<1x256xf32, #tpu.memory_space<vmem>>, vector<1x256xf32>
    %cst_110 = arith.constant dense<0.000000e+00> : vector<16x256xf32>
    %169 = tpu.matmul %131, %165, %cst_110 {dimension_numbers = #tpu.dot_dimension_numbers<[1], [0], [0], [1], [0, 0, 1, 1], [], []>} : vector<16x128xbf16>, vector<128x256xbf16>, vector<16x256xf32> -> vector<16x256xf32>
    %cst_111 = arith.constant dense<0.000000e+00> : vector<16x256xf32>
    %170 = tpu.matmul %141, %167, %cst_111 {dimension_numbers = #tpu.dot_dimension_numbers<[1], [0], [0], [1], [0, 0, 1, 1], [], []>} : vector<16x128xbf16>, vector<128x256xbf16>, vector<16x256xf32> -> vector<16x256xf32>
    %171 = arith.addf %169, %170 : vector<16x256xf32>
    %172 = vector.broadcast %168 : vector<1x256xf32> to vector<16x256xf32>
    %173 = arith.addf %171, %172 : vector<16x256xf32>
    %cst_112 = arith.constant 0.000000e+00 : f32
    %174 = vector.broadcast %cst_112 : f32 to vector<16x256xf32>
    %175 = arith.maximumf %173, %174 : vector<16x256xf32>
    %176 = arith.truncf %175 : vector<16x256xf32> to vector<16x256xbf16>
    %cst_113 = arith.constant dense<0.000000e+00> : vector<16x256xf32>
    %177 = tpu.matmul %151, %165, %cst_113 {dimension_numbers = #tpu.dot_dimension_numbers<[1], [0], [0], [1], [0, 0, 1, 1], [], []>} : vector<16x128xbf16>, vector<128x256xbf16>, vector<16x256xf32> -> vector<16x256xf32>
    %cst_114 = arith.constant dense<0.000000e+00> : vector<16x256xf32>
    %178 = tpu.matmul %141, %163, %cst_114 {dimension_numbers = #tpu.dot_dimension_numbers<[1], [0], [0], [1], [0, 0, 1, 1], [], []>} : vector<16x128xbf16>, vector<128x256xbf16>, vector<16x256xf32> -> vector<16x256xf32>
    %179 = arith.addf %177, %178 : vector<16x256xf32>
    %cst_115 = arith.constant dense<0.000000e+00> : vector<16x256xf32>
    %180 = tpu.matmul %161, %167, %cst_115 {dimension_numbers = #tpu.dot_dimension_numbers<[1], [0], [0], [1], [0, 0, 1, 1], [], []>} : vector<16x128xbf16>, vector<128x256xbf16>, vector<16x256xf32> -> vector<16x256xf32>
    %181 = arith.addf %179, %180 : vector<16x256xf32>
    %182 = vector.broadcast %168 : vector<1x256xf32> to vector<16x256xf32>
    %183 = arith.addf %181, %182 : vector<16x256xf32>
    %cst_116 = arith.constant 0.000000e+00 : f32
    %184 = vector.broadcast %cst_116 : f32 to vector<16x256xf32>
    %185 = arith.maximumf %183, %184 : vector<16x256xf32>
    %186 = arith.truncf %185 : vector<16x256xf32> to vector<16x256xbf16>
    %c1_117 = arith.constant 1 : index
    %c0_118 = arith.constant 0 : index
    %c0_119 = arith.constant 0 : index
    %187 = vector.load %arg8[%c1_117, %c0_118, %c0_119] : memref<3x256x512xbf16, #tpu.memory_space<vmem>>, vector<1x256x512xbf16>
    %188 = vector.shape_cast %187 : vector<1x256x512xbf16> to vector<256x512xbf16>
    %c2_120 = arith.constant 2 : index
    %c0_121 = arith.constant 0 : index
    %c0_122 = arith.constant 0 : index
    %189 = vector.load %arg8[%c2_120, %c0_121, %c0_122] : memref<3x256x512xbf16, #tpu.memory_space<vmem>>, vector<1x256x512xbf16>
    %190 = vector.shape_cast %189 : vector<1x256x512xbf16> to vector<256x512xbf16>
    %c0_123 = arith.constant 0 : index
    %c0_124 = arith.constant 0 : index
    %191 = vector.load %arg9[%c0_123, %c0_124] : memref<1x512xf32, #tpu.memory_space<vmem>>, vector<1x512xf32>
    %cst_125 = arith.constant dense<0.000000e+00> : vector<16x512xf32>
    %192 = tpu.matmul %176, %188, %cst_125 {dimension_numbers = #tpu.dot_dimension_numbers<[1], [0], [0], [1], [0, 0, 1, 1], [], []>} : vector<16x256xbf16>, vector<256x512xbf16>, vector<16x512xf32> -> vector<16x512xf32>
    %cst_126 = arith.constant dense<0.000000e+00> : vector<16x512xf32>
    %193 = tpu.matmul %186, %190, %cst_126 {dimension_numbers = #tpu.dot_dimension_numbers<[1], [0], [0], [1], [0, 0, 1, 1], [], []>} : vector<16x256xbf16>, vector<256x512xbf16>, vector<16x512xf32> -> vector<16x512xf32>
    %194 = arith.addf %192, %193 : vector<16x512xf32>
    %195 = vector.broadcast %191 : vector<1x512xf32> to vector<16x512xf32>
    %196 = arith.addf %194, %195 : vector<16x512xf32>
    %cst_127 = arith.constant 0.000000e+00 : f32
    %197 = vector.broadcast %cst_127 : f32 to vector<16x512xf32>
    %198 = arith.maximumf %196, %197 : vector<16x512xf32>
    %cst_128 = arith.constant 1.000000e+00 : f32
    %199 = vector.broadcast %cst_128 : f32 to vector<16x512xf32>
    %200 = arith.mulf %198, %199 : vector<16x512xf32>
    %c0_129 = arith.constant 0 : index
    %c0_130 = arith.constant 0 : index
    %201 = vector.load %arg10[%c0_129, %c0_130] : memref<16x512xf32, #tpu.memory_space<vmem>>, vector<16x512xf32>
    tpu.vector_store %arg10[%c0_129, %c0_130], %200 {strides = array<i32>} : memref<16x512xf32, #tpu.memory_space<vmem>>, vector<16x512xf32>,
    return
  }
  func.func @transform_0(%arg0: i32) -> (i32, i32, i32) {
    %c0_i32 = arith.constant 0 : i32
    %c0_i32_0 = arith.constant 0 : i32
    %c0_i32_1 = arith.constant 0 : i32
    return %c0_i32, %arg0, %c0_i32_0 : i32, i32, i32
  }
  func.func @transform_1(%arg0: i32) -> (i32, i32, i32) {
    %c0_i32 = arith.constant 0 : i32
    %c0_i32_0 = arith.constant 0 : i32
    %c0_i32_1 = arith.constant 0 : i32
    %c0_i32_2 = arith.constant 0 : i32
    return %c0_i32, %c0_i32_0, %c0_i32_1 : i32, i32, i32
  }
  func.func @transform_2(%arg0: i32) -> (i32, i32) {
    %c0_i32 = arith.constant 0 : i32
    %c0_i32_0 = arith.constant 0 : i32
    %c0_i32_1 = arith.constant 0 : i32
    return %c0_i32, %c0_i32_0 : i32, i32
  }
  func.func @transform_3(%arg0: i32) -> (i32, i32, i32) {
    %c0_i32 = arith.constant 0 : i32
    %c0_i32_0 = arith.constant 0 : i32
    %c0_i32_1 = arith.constant 0 : i32
    %c0_i32_2 = arith.constant 0 : i32
    return %c0_i32, %c0_i32_0, %c0_i32_1 : i32, i32, i32
  }
  func.func @transform_4(%arg0: i32) -> (i32, i32) {
    %c0_i32 = arith.constant 0 : i32
    %c0_i32_0 = arith.constant 0 : i32
    %c0_i32_1 = arith.constant 0 : i32
    return %c0_i32, %c0_i32_0 : i32, i32
  }
  func.func @transform_5(%arg0: i32) -> (i32, i32, i32) {
    %c0_i32 = arith.constant 0 : i32
    %c0_i32_0 = arith.constant 0 : i32
    %c0_i32_1 = arith.constant 0 : i32
    %c0_i32_2 = arith.constant 0 : i32
    return %c0_i32, %c0_i32_0, %c0_i32_1 : i32, i32, i32
  }
  func.func @transform_6(%arg0: i32) -> (i32, i32) {
    %c0_i32 = arith.constant 0 : i32
    %c0_i32_0 = arith.constant 0 : i32
    %c0_i32_1 = arith.constant 0 : i32
    return %c0_i32, %c0_i32_0 : i32, i32
  }
  func.func @transform_7(%arg0: i32) -> (i32, i32, i32) {
    %c0_i32 = arith.constant 0 : i32
    %c0_i32_0 = arith.constant 0 : i32
    %c0_i32_1 = arith.constant 0 : i32
    %c0_i32_2 = arith.constant 0 : i32
    return %c0_i32, %c0_i32_0, %c0_i32_1 : i32, i32, i32
  }
  func.func @transform_8(%arg0: i32) -> (i32, i32) {
    %c0_i32 = arith.constant 0 : i32
    %c0_i32_0 = arith.constant 0 : i32
    %c0_i32_1 = arith.constant 0 : i32
    return %c0_i32, %c0_i32_0 : i32, i32
  }
  func.func @transform_9(%arg0: i32) -> (i32, i32) {
    %c0_i32 = arith.constant 0 : i32
    %c0_i32_0 = arith.constant 0 : i32
    return %arg0, %c0_i32 : i32, i32
  }
}

</mosaic_0001>

<bundles_post_ra>
// kernel: _lambda_.1
= control target key start
LH: loop header
LB: loop body
LE: loop exit
PB: predicated region body
PF: predicated region fallthrough
CT: control target
= control target key end

     0   :  { %vm95_vm0 = vcmask 1041408   ;;  %vm91_vm1 = vcmask 31744   ;;  %v4502_v0 = vmov 0.0   ;;  %vm4503_vm2 = vmmov 0   ;;  %s5609_s1 = inlined_call_operand.vmem [shape: bf16[3,4,64], index: 1, kind: input, shape index: {}]   ;;  %s5610_s0 = inlined_call_operand.vmem [shape: bf16[16,16,4], index: 0, kind: input, shape index: {}]   ;;  %s5611_s3 = inlined_call_operand.vmem [shape: bf16[3,64,128], index: 3, kind: input, shape index: {}]   ;;  %s5612_s2 = inlined_call_operand.vmem [shape: f32[1,64], index: 2, kind: input, shape index: {}]   ;;  %s5613_s5 = inlined_call_operand.vmem [shape: bf16[3,128,256], index: 5, kind: input, shape index: {}]   ;;  %s5614_s7 = inlined_call_operand.vmem [shape: bf16[3,256,512], index: 7, kind: input, shape index: {}]   ;;  %s5615_s4 = inlined_call_operand.vmem [shape: f32[1,128], index: 4, kind: input, shape index: {}]   ;;  %s5616_s6 = inlined_call_operand.vmem [shape: f32[1,256], index: 6, kind: input, shape index: {}]   ;;  %s5617_s8 = inlined_call_operand.vmem [shape: f32[1,512], index: 8, kind: input, shape index: {}]   ;;  %s5618_s9 = inlined_call_operand.vmem [shape: f32[16,512], index: 9, kind: output, shape index: {}]  }
   0x1   :  { %3917 = vmatprep.subr.bf16.mxu0 %v4502_v0  ;;  %3923 = vmatprep.subr.bf16.mxu1 %v4502_v0  ;;  %v3399_v1 = vld [vmem:[%s5609_s1 + $0x4] sm:$0x3]  ;;  %v3398_v2 = vld [vmem:[%s5609_s1 + $0x2] sm:$0x3]  ;;  %v4210_v5 = vld [vmem:[%s5610_s0 + $0x8] sm:$0xff]   ;;  %vm1279_vm3 = vcmask 523264  }
   0x2   :  { %v4564_v3 = vsel %vm95_vm0, %v3399_v1, 0  ;;  %v4567_v4 = vsel %vm95_vm0, %v3398_v2, 0  ;;  %3919 = vmatprep.mubr.msk.bf16.mxu0 %vm4503_vm2, %v4502_v0  ;;  %3925 = vmatprep.mubr.msk.bf16.mxu1 %vm4503_vm2, %v4502_v0  ;;  %v4211_v6 = vld [vmem:[%s5610_s0] sm:$0xff]   ;;  %v4212_v9 = vld [vmem:[%s5610_s0 + $0x10] sm:$0xff]   ;;  %v4213_v10 = vld [vmem:[%s5610_s0 + $0x18] sm:$0xff]  }
   0x3   :  { %3918 = vmatpush3.bf16.msra.mxu0 %v4564_v3  ;;  %3924 = vmatpush3.bf16.msra.mxu1 %v4567_v4  ;;  %v80_v7 = vld [vmem:[%s5609_s1] sm:$0x3]  ;;  %v4215_v12 = vld [vmem:[%s5610_s0 + $0x28] sm:$0xff]   ;;  %v4216_v13 = vld [vmem:[%s5610_s0 + $0x30] sm:$0xff]  }
   0x4   :  { %3929 = vmatprep.subr.bf16.mxu0 %v4502_v0  ;;  %v4586_v8 = vsel %vm95_vm0, %v80_v7, 0  ;;  %3935 = vmatprep.subr.bf16.mxu1 %v4502_v0  ;;  %v4214_v11 = vld [vmem:[%s5610_s0 + $0x20] sm:$0xff]   ;;  %v4217_v14 = vld [vmem:[%s5610_s0 + $0x38] sm:$0xff]   ;;  %v4219_v16 = vld [vmem:[%s5610_s0 + $0x48] sm:$0xff]  }
   0x5   :  { %v4218_v15 = vld [vmem:[%s5610_s0 + $0x40] sm:$0xff]   ;;  %v4220_v17 = vld [vmem:[%s5610_s0 + $0x50] sm:$0xff]   ;;  %v4221_v18 = vld [vmem:[%s5610_s0 + $0x58] sm:$0xff]  }
   0x6   :  { %3920 = vmatmul.mubr.msk.bf16.vlgmr.msra.gmra.mrb[0].mxu0 %vm91_vm1, %v4210_v5  ;;  %3926 = vmatmul.mubr.msk.bf16.vlgmr.msra.gmra.mrb[0].mxu1 %vm91_vm1, %v4211_v6  ;;  %v4222_v19 = vld [vmem:[%s5610_s0 + $0x60] sm:$0xff]   ;;  %v4223_v20 = vld [vmem:[%s5610_s0 + $0x68] sm:$0xff]   ;;  %v4224_v21 = vld [vmem:[%s5610_s0 + $0x70] sm:$0xff]  }
   0x7   :  { %3930 = vmatpush3.bf16.msra.mxu0 %v4586_v8  ;;  %3936 = vmatpush3.bf16.msra.mxu1 %v4567_v4  ;;  %v4225_v22 = vld [vmem:[%s5610_s0 + $0x78] sm:$0xff]   ;;  %v4745_v23 = vld [vmem:[%s5611_s3 + $0x40] sm:$0xff]   ;;  %v4756_v25 = vld [vmem:[%s5611_s3 + $0x48] sm:$0xff]  }
   0x8   :  { %3931 = vmatprep.mubr.msk.bf16.mxu0 %vm4503_vm2, %v4502_v0  ;;  %3937 = vmatprep.mubr.msk.bf16.mxu1 %vm4503_vm2, %v4502_v0  ;;  %v4750_v24 = vld [vmem:[%s5611_s3] sm:$0xff]   ;;  %v4764_v26 = vld [vmem:[%s5611_s3 + $0x8] sm:$0xff]   ;;  %v4772_v27 = vld [vmem:[%s5611_s3 + $0x50] sm:$0xff]  }
   0x9   :  { %3941 = vmatprep.subr.bf16.mxu0 %v4502_v0  ;;  %3947 = vmatprep.subr.bf16.mxu1 %v4502_v0  ;;  %v4778_v28 = vld [vmem:[%s5611_s3 + $0x10] sm:$0xff]   ;;  %v4786_v29 = vld [vmem:[%s5611_s3 + $0x58] sm:$0xff]   ;;  %v4801_v32 = vld [vmem:[%s5612_s2] ss:$0 sm:$0xff] }
   0xa   :  { %v4792_v30 = vld [vmem:[%s5611_s3 + $0x18] sm:$0xff]  }
   0xe   :  { %3932 = vmatmul.mubr.msk.bf16.vlgmr.msra.gmra.mrb[4].mxu0 %vm91_vm1, %v4210_v5  ;;  %3938 = vmatmul.mubr.msk.bf16.vlgmr.msra.gmra.mrb[4].mxu1 %vm91_vm1, %v4212_v9 }
   0xf   :  { %3942 = vmatpush3.bf16.msra.mxu0 %v4564_v3  ;;  %3943 = vmatprep.mubr.msk.bf16.mxu0 %vm4503_vm2, %v4502_v0 }
  0x10   :  { %3948 = vmatpush3.bf16.msra.mxu1 %v4586_v8  ;;  %3953 = vmatprep.subr.bf16.mxu0 %v4502_v0 }
  0x11   :  { %3949 = vmatprep.mubr.msk.bf16.mxu1 %vm4503_vm2, %v4502_v0  ;;  %3959 = vmatprep.subr.bf16.mxu1 %v4502_v0 }
  0x16   :  { %3944 = vmatmul.mubr.msk.bf16.vlgmr.msra.gmra.mrb[8].mxu0 %vm91_vm1, %v4213_v10  ;;  %3950 = vmatmul.mubr.msk.bf16.vlgmr.msra.gmra.mrb[8].mxu1 %vm91_vm1, %v4213_v10 }
  0x17   :  { %3954 = vmatpush3.bf16.msra.mxu0 %v4567_v4  ;;  %3955 = vmatprep.mubr.msk.bf16.mxu0 %vm4503_vm2, %v4502_v0 }
  0x18   :  { %3960 = vmatpush3.bf16.msra.mxu1 %v4564_v3  ;;  %3965 = vmatprep.subr.bf16.mxu0 %v4502_v0 }
  0x19   :  { %3961 = vmatprep.mubr.msk.bf16.mxu1 %vm4503_vm2, %v4502_v0  ;;  %3971 = vmatprep.subr.bf16.mxu1 %v4502_v0 }
  0x1e   :  { %3956 = vmatmul.mubr.msk.bf16.vlgmr.msra.gmra.mrb[12].mxu0 %vm91_vm1, %v4214_v11  ;;  %3962 = vmatmul.mubr.msk.bf16.vlgmr.msra.gmra.mrb[12].mxu1 %vm91_vm1, %v4215_v12 }
  0x1f   :  { %3966 = vmatpush3.bf16.msra.mxu0 %v4586_v8  ;;  %3967 = vmatprep.mubr.msk.bf16.mxu0 %vm4503_vm2, %v4502_v0 }
  0x20   :  { %3972 = vmatpush3.bf16.msra.mxu1 %v4567_v4  ;;  %3977 = vmatprep.subr.bf16.mxu0 %v4502_v0 }
  0x21   :  { %3973 = vmatprep.mubr.msk.bf16.mxu1 %vm4503_vm2, %v4502_v0  ;;  %3983 = vmatprep.subr.bf16.mxu1 %v4502_v0 }
  0x26   :  { %3968 = vmatmul.mubr.msk.bf16.vlgmr.msra.gmra.mrb[16].mxu0 %vm91_vm1, %v4215_v12  ;;  %3974 = vmatmul.mubr.msk.bf16.vlgmr.msra.gmra.mrb[16].mxu1 %vm91_vm1, %v4216_v13 }
  0x27   :  { %3978 = vmatpush3.bf16.msra.mxu0 %v4564_v3  ;;  %3979 = vmatprep.mubr.msk.bf16.mxu0 %vm4503_vm2, %v4502_v0 }
  0x28   :  { %3984 = vmatpush3.bf16.msra.mxu1 %v4586_v8  ;;  %3985 = vmatprep.mubr.msk.bf16.mxu1 %vm4503_vm2, %v4502_v0 }
  0x29   :  { %3989 = vmatprep.subr.bf16.mxu0 %v4502_v0  ;;  %3995 = vmatprep.subr.bf16.mxu1 %v4502_v0 }
  0x2e   :  { %3980 = vmatmul.mubr.msk.bf16.vlgmr.msra.gmra.mrb[20].mxu0 %vm91_vm1, %v4217_v14  ;;  %3986 = vmatmul.mubr.msk.bf16.vlgmr.msra.gmra.mrb[20].mxu1 %vm91_vm1, %v4217_v14 }
  0x2f   :  { %3990 = vmatpush3.bf16.msra.mxu0 %v4567_v4  ;;  %3991 = vmatprep.mubr.msk.bf16.mxu0 %vm4503_vm2, %v4502_v0 }
  0x30   :  { %3996 = vmatpush3.bf16.msra.mxu1 %v4564_v3  ;;  %3997 = vmatprep.mubr.msk.bf16.mxu1 %vm4503_vm2, %v4502_v0 }
  0x31   :  { %4001 = vmatprep.subr.bf16.mxu0 %v4502_v0  ;;  %4007 = vmatprep.subr.bf16.mxu1 %v4502_v0 }
  0x36   :  { %3992 = vmatmul.mubr.msk.bf16.vlgmr.msra.gmra.mrb[24].mxu0 %vm91_vm1, %v4218_v15  ;;  %3998 = vmatmul.mubr.msk.bf16.vlgmr.msra.gmra.mrb[24].mxu1 %vm91_vm1, %v4219_v16 }
  0x37   :  { %4002 = vmatpush3.bf16.msra.mxu0 %v4586_v8  ;;  %4003 = vmatprep.mubr.msk.bf16.mxu0 %vm4503_vm2, %v4502_v0 }
  0x38   :  { %4008 = vmatpush3.bf16.msra.mxu1 %v4567_v4  ;;  %4013 = vmatprep.subr.bf16.mxu0 %v4502_v0 }
  0x39   :  { %4009 = vmatprep.mubr.msk.bf16.mxu1 %vm4503_vm2, %v4502_v0  ;;  %4019 = vmatprep.subr.bf16.mxu1 %v4502_v0 }
  0x3e   :  { %4004 = vmatmul.mubr.msk.bf16.vlgmr.msra.gmra.mrb[28].mxu0 %vm91_vm1, %v4219_v16  ;;  %4010 = vmatmul.mubr.msk.bf16.vlgmr.msra.gmra.mrb[28].mxu1 %vm91_vm1, %v4220_v17 }
  0x3f   :  { %4014 = vmatpush3.bf16.msra.mxu0 %v4564_v3  ;;  %4015 = vmatprep.mubr.msk.bf16.mxu0 %vm4503_vm2, %v4502_v0 }
  0x40   :  { %4020 = vmatpush3.bf16.msra.mxu1 %v4586_v8  ;;  %4025 = vmatprep.subr.bf16.mxu0 %v4502_v0 }
  0x41   :  { %4021 = vmatprep.mubr.msk.bf16.mxu1 %vm4503_vm2, %v4502_v0  ;;  %4031 = vmatprep.subr.bf16.mxu1 %v4502_v0 }
  0x46   :  { %4016 = vmatmul.mubr.msk.bf16.vlgmr.msra.gmra.mrb[32].mxu0 %vm91_vm1, %v4221_v18  ;;  %4022 = vmatmul.mubr.msk.bf16.vlgmr.msra.gmra.mrb[32].mxu1 %vm91_vm1, %v4221_v18 }
  0x47   :  { %4026 = vmatpush3.bf16.msra.mxu0 %v4567_v4  ;;  %4027 = vmatprep.mubr.msk.bf16.mxu0 %vm4503_vm2, %v4502_v0 }
  0x48   :  { %4032 = vmatpush3.bf16.msra.mxu1 %v4564_v3  ;;  %4037 = vmatprep.subr.bf16.mxu0 %v4502_v0 }
  0x49   :  { %4033 = vmatprep.mubr.msk.bf16.mxu1 %vm4503_vm2, %v4502_v0  ;;  %4043 = vmatprep.subr.bf16.mxu1 %v4502_v0 }
  0x4e   :  { %4028 = vmatmul.mubr.msk.bf16.vlgmr.msra.gmra.mrb[36].mxu0 %vm91_vm1, %v4222_v19  ;;  %4034 = vmatmul.mubr.msk.bf16.vlgmr.msra.gmra.mrb[36].mxu1 %vm91_vm1, %v4223_v20 }
  0x4f   :  { %4038 = vmatpush3.bf16.msra.mxu0 %v4586_v8  ;;  %4039 = vmatprep.mubr.msk.bf16.mxu0 %vm4503_vm2, %v4502_v0  ;;  %v4812_v8 = vld [vmem:[%s5611_s3 + $0x20] sm:$0xff]  }
  0x50   :  { %4044 = vmatpush3.bf16.msra.mxu1 %v4567_v4  ;;  %4049 = vmatprep.subr.bf16.mxu0 %v4502_v0 }
  0x51   :  { %4045 = vmatprep.mubr.msk.bf16.mxu1 %vm4503_vm2, %v4502_v0  ;;  %4079 = vmatprep.subr.bf16.mxu1 %v4502_v0 }
  0x56   :  { %4040 = vmatmul.mubr.msk.bf16.vlgmr.msra.gmra.mrb[40].mxu0 %vm91_vm1, %v4223_v20  ;;  %4046 = vmatmul.mubr.msk.bf16.vlgmr.msra.gmra.mrb[40].mxu1 %vm91_vm1, %v4224_v21  ;;  %v4820_v21 = vld [vmem:[%s5611_s3 + $0x28] sm:$0xff]  }
  0x57   :  { %4050 = vmatpush3.bf16.msra.mxu0 %v4564_v3  ;;  %4051 = vmatprep.mubr.msk.bf16.mxu0 %vm4503_vm2, %v4502_v0 }
  0x58   :  { %4055 = vmatprep.subr.bf16.mxu0 %v4502_v0  ;;  %4087 = vmatprep.mubr.msk.bf16.mxu1 %vm4503_vm2, %v4502_v0 }
  0x59   :  { %4080 = vmatpush3.bf16.msra.mxu1 %v4750_v24 }
  0x5a   :  { %4081 = vmatprep.subr.bf16.mxu1 %v4502_v0 }
  0x5d   :  { %4082 = vmatpush3.bf16.msra.mxu1 %v4764_v26 }
  0x5e   :  { %4052 = vmatmul.mubr.msk.bf16.vlgmr.msra.gmra.mrb[44].mxu0 %vm91_vm1, %v4225_v22  ;;  %4083 = vmatprep.subr.bf16.mxu1 %v4502_v0 }
  0x5f   :  { %4063 = vmatprep.mubr.msk.bf16.mxu0 %vm4503_vm2, %v4502_v0  ;;  %4056 = vmatpush3.bf16.msra.mxu0 %v4745_v23 }
  0x60   :  { %4057 = vmatprep.subr.bf16.mxu0 %v4502_v0 }
  0x61   :  { %4084 = vmatpush3.bf16.msra.mxu1 %v4778_v28 }
  0x62   :  { %4085 = vmatprep.subr.bf16.mxu1 %v4502_v0 }
  0x63   :  { %4058 = vmatpush3.bf16.msra.mxu0 %v4756_v25 }
  0x64   :  { %4059 = vmatprep.subr.bf16.mxu0 %v4502_v0 }
  0x65   :  { %4086 = vmatpush3.bf16.msra.mxu1 %v4792_v30 }
  0x66   :  { %4103 = vmatprep.subr.bf16.mxu1 %v4502_v0 }
  0x67   :  { %4060 = vmatpush3.bf16.msra.mxu0 %v4772_v27 }
  0x68   :  { %4061 = vmatprep.subr.bf16.mxu0 %v4502_v0 }
  0x6b   :  { %4062 = vmatpush3.bf16.msra.mxu0 %v4786_v29 }
  0x6c   :  { %4067 = vmatprep.subr.bf16.mxu0 %v4502_v0 }
  0xd9   :  { %v133_v31 = vpop.f32.mrb[0].mxu0  ;;  %v185_v33 = vpop.f32.mrb[0].mxu1 }
  0xda   :  { %v186_v34 = vadd.f32 %v185_v33, %v133_v31  ;;  %v3921_v35 = vpop.f32.mrb[1].mxu0  ;;  %v3927_v36 = vpop.f32.mrb[1].mxu1 }
  0xdb   :  { %v136_v37 = vpop.f32.mrb[2].mxu0  ;;  %v188_v38 = vpop.f32.mrb[2].mxu1  ;;  %v4835_v35 = vld [vmem:[%s5611_s3 + $0x30] sm:$0xff]  }
  0xdc   :  { %v198_v39 = vadd.f32 %v4801_v32, %v186_v34  ;;  %v189_v40 = vadd.f32 %v188_v38, %v136_v37  ;;  %v3922_v41 = vpop.f32.mrb[3].mxu0  ;;  %v3928_v42 = vpop.f32.mrb[3].mxu1 }
  0xde   :  { %v199_v43 = vadd.f32 %v4801_v32, %v189_v40  ;;  %v200_v44 = vmax.f32 %v198_v39, 0.0 }
  0xe0   :  { %v201_v45 = vmax.f32 %v199_v43, 0.0 }
  0xe1   :  { %v240_v46 = vpop.f32.mrb[4].mxu0  ;;  %v289_v47 = vpop.f32.mrb[4].mxu1 }
  0xe2   :  { %v4805_v48 = vpack.c.bf16 %v201_v45, %v200_v44  ;;  %v290_v49 = vadd.f32 %v289_v47, %v240_v46  ;;  %v3933_v50 = vpop.f32.mrb[5].mxu0  ;;  %v3939_v51 = vpop.f32.mrb[5].mxu1 }
  0xe3   :  { %v243_v52 = vpop.f32.mrb[6].mxu0  ;;  %v292_v53 = vpop.f32.mrb[6].mxu1 }
  0xe4   :  { %v293_v54 = vadd.f32 %v292_v53, %v243_v52  ;;  %v3934_v55 = vpop.f32.mrb[7].mxu0  ;;  %v3940_v56 = vpop.f32.mrb[7].mxu1 }
  0xe9   :  { %v338_v57 = vpop.f32.mrb[8].mxu0  ;;  %v386_v58 = vpop.f32.mrb[8].mxu1 }
  0xea   :  { %v345_v59 = vadd.f32 %v338_v57, %v290_v49  ;;  %v3945_v60 = vpop.f32.mrb[9].mxu0  ;;  %v3951_v61 = vpop.f32.mrb[9].mxu1  ;;  %v4846_v49 = vld [vmem:[%s5611_s3 + $0x38] sm:$0xff]  }
  0xeb   :  { %v341_v62 = vpop.f32.mrb[10].mxu0  ;;  %v389_v63 = vpop.f32.mrb[10].mxu1 }
  0xec   :  { %v347_v1 = vadd.f32 %v4801_v32, %v345_v59  ;;  %v346_v2 = vadd.f32 %v341_v62, %v293_v54  ;;  %v3946_v3 = vpop.f32.mrb[11].mxu0  ;;  %v3952_v4 = vpop.f32.mrb[11].mxu1 }
  0xee   :  { %v348_v5 = vadd.f32 %v4801_v32, %v346_v2  ;;  %v349_v6 = vmax.f32 %v347_v1, 0.0 }
  0xf0   :  { %v350_v7 = vmax.f32 %v348_v5, 0.0 }
  0xf1   :  { %v435_v9 = vpop.f32.mrb[12].mxu0  ;;  %v484_v10 = vpop.f32.mrb[12].mxu1 }
  0xf2   :  { %v351_v11 = vpack.c.bf16 %v350_v7, %v349_v6  ;;  %v436_v12 = vadd.f32 %v435_v9, %v386_v58  ;;  %v3957_v13 = vpop.f32.mrb[13].mxu0  ;;  %v3963_v14 = vpop.f32.mrb[13].mxu1 }
  0xf3   :  { %v438_v15 = vpop.f32.mrb[14].mxu0  ;;  %v487_v16 = vpop.f32.mrb[14].mxu1 }
  0xf4   :  { %4064 = vmatmul.mubr.msk.bf16.vlgmr.msra.gmra.mrb[48].mxu0 %vm1279_vm3, %v351_v11  ;;  %4088 = vmatmul.mubr.msk.bf16.vlgmr.msra.gmra.mrb[44].mxu1 %vm1279_vm3, %v351_v11  ;;  %v439_v17 = vadd.f32 %v438_v15, %v389_v63  ;;  %v491_v18 = vadd.f32 %v484_v10, %v436_v12  ;;  %v3958_v19 = vpop.f32.mrb[15].mxu0  ;;  %v3964_v20 = vpop.f32.mrb[15].mxu1 }
  0xf5   :  { %4068 = vmatpush3.bf16.msra.mxu0 %v4812_v8  ;;  %4104 = vmatpush3.bf16.msra.mxu1 %v4745_v23 }
  0xf6   :  { %4069 = vmatprep.subr.bf16.mxu0 %v4502_v0  ;;  %v493_v22 = vadd.f32 %v4801_v32, %v491_v18  ;;  %v492_v31 = vadd.f32 %v487_v16, %v439_v17  ;;  %4105 = vmatprep.subr.bf16.mxu1 %v4502_v0 }
  0xf7   :  { %4075 = vmatprep.mubr.msk.bf16.mxu0 %vm4503_vm2, %v4502_v0  ;;  %4111 = vmatprep.mubr.msk.bf16.mxu1 %vm4503_vm2, %v4502_v0 }
  0xf8   :  { %v495_v33 = vmax.f32 %v493_v22, 0.0  ;;  %v494_v34 = vadd.f32 %v4801_v32, %v492_v31 }
  0xf9   :  { %4070 = vmatpush3.bf16.msra.mxu0 %v4820_v21  ;;  %v532_v36 = vpop.f32.mrb[16].mxu0  ;;  %v581_v37 = vpop.f32.mrb[16].mxu1  ;;  %4106 = vmatpush3.bf16.msra.mxu1 %v4756_v25 }
  0xfa   :  { %v496_v38 = vmax.f32 %v494_v34, 0.0  ;;  %4071 = vmatprep.subr.bf16.mxu0 %v4502_v0  ;;  %v3969_v39 = vpop.f32.mrb[17].mxu0  ;;  %v582_v40 = vadd.f32 %v581_v37, %v532_v36  ;;  %v3975_v41 = vpop.f32.mrb[17].mxu1  ;;  %4107 = vmatprep.subr.bf16.mxu1 %v4502_v0 }
  0xfb   :  { %v535_v42 = vpop.f32.mrb[18].mxu0  ;;  %v584_v43 = vpop.f32.mrb[18].mxu1 }
  0xfc   :  { %v4840_v44 = vpack.c.bf16 %v496_v38, %v495_v33  ;;  %v3970_v45 = vpop.f32.mrb[19].mxu0  ;;  %v585_v46 = vadd.f32 %v584_v43, %v535_v42  ;;  %v3976_v47 = vpop.f32.mrb[19].mxu1 }
  0xfd   :  { %4072 = vmatpush3.bf16.msra.mxu0 %v4835_v35  ;;  %4108 = vmatpush3.bf16.msra.mxu1 %v4772_v27 }
  0xfe   :  { %4073 = vmatprep.subr.bf16.mxu0 %v4502_v0  ;;  %4109 = vmatprep.subr.bf16.mxu1 %v4502_v0 }
 0x101   :  { %4074 = vmatpush3.bf16.msra.mxu0 %v4846_v49  ;;  %v630_v50 = vpop.f32.mrb[20].mxu0  ;;  %4110 = vmatpush3.bf16.msra.mxu1 %v4786_v29  ;;  %v678_v51 = vpop.f32.mrb[20].mxu1 }
 0x102   :  { %v637_v52 = vadd.f32 %v630_v50, %v582_v40  ;;  %v3981_v53 = vpop.f32.mrb[21].mxu0  ;;  %4091 = vmatprep.subr.bf16.mxu0 %v4502_v0  ;;  %4127 = vmatprep.subr.bf16.mxu1 %v4502_v0  ;;  %v3987_v54 = vpop.f32.mrb[21].mxu1 }
 0x103   :  { %v633_v55 = vpop.f32.mrb[22].mxu0  ;;  %v681_v56 = vpop.f32.mrb[22].mxu1 }
 0x104   :  { %v639_v57 = vadd.f32 %v4801_v32, %v637_v52  ;;  %v638_v58 = vadd.f32 %v633_v55, %v585_v46  ;;  %4076 = vmatmul.mubr.msk.bf16.vlgmr.msra.gmra.mrb[52].mxu0 %vm1279_vm3, %v4805_v48  ;;  %v3982_v59 = vpop.f32.mrb[23].mxu0  ;;  %v3988_v60 = vpop.f32.mrb[23].mxu1 }
 0x105   :  { %4092 = vmatpush3.bf16.msra.mxu0 %v4812_v8  ;;  %4099 = vmatprep.mubr.msk.bf16.mxu0 %vm4503_vm2, %v4502_v0 }
 0x106   :  { %v641_v61 = vmax.f32 %v639_v57, 0.0  ;;  %v640_v62 = vadd.f32 %v4801_v32, %v638_v58  ;;  %4093 = vmatprep.subr.bf16.mxu0 %v4502_v0 }
 0x108   :  { %v642_v63 = vmax.f32 %v640_v62, 0.0 }
 0x109   :  { %4094 = vmatpush3.bf16.msra.mxu0 %v4820_v21  ;;  %v727_v1 = vpop.f32.mrb[24].mxu0  ;;  %v776_v2 = vpop.f32.mrb[24].mxu1 }
 0x10a   :  { %v4864_v3 = vpack.c.bf16 %v642_v63, %v641_v61  ;;  %4095 = vmatprep.subr.bf16.mxu0 %v4502_v0  ;;  %v728_v48 = vadd.f32 %v727_v1, %v678_v51  ;;  %v3993_v4 = vpop.f32.mrb[25].mxu0  ;;  %v3999_v5 = vpop.f32.mrb[25].mxu1 }
 0x10b   :  { %v730_v6 = vpop.f32.mrb[26].mxu0  ;;  %v779_v7 = vpop.f32.mrb[26].mxu1 }
 0x10c   :  { %4112 = vmatmul.mubr.msk.bf16.vlgmr.msra.gmra.mrb[48].mxu1 %vm1279_vm3, %v4864_v3  ;;  %v731_v9 = vadd.f32 %v730_v6, %v681_v56  ;;  %v783_v10 = vadd.f32 %v776_v2, %v728_v48  ;;  %v3994_v11 = vpop.f32.mrb[27].mxu0  ;;  %v4000_v12 = vpop.f32.mrb[27].mxu1 }
 0x10d   :  { %4096 = vmatpush3.bf16.msra.mxu0 %v4835_v35  ;;  %4128 = vmatpush3.bf16.msra.mxu1 %v4812_v8 }
 0x10e   :  { %4097 = vmatprep.subr.bf16.mxu0 %v4502_v0  ;;  %4129 = vmatprep.subr.bf16.mxu1 %v4502_v0  ;;  %v785_v13 = vadd.f32 %v4801_v32, %v783_v10  ;;  %v784_v14 = vadd.f32 %v779_v7, %v731_v9 }
 0x10f   :  { %4135 = vmatprep.mubr.msk.bf16.mxu1 %vm4503_vm2, %v4502_v0 }
 0x110   :  { %v787_v15 = vmax.f32 %v785_v13, 0.0  ;;  %v786_v16 = vadd.f32 %v4801_v32, %v784_v14 }
 0x111   :  { %4098 = vmatpush3.bf16.msra.mxu0 %v4846_v49  ;;  %4130 = vmatpush3.bf16.msra.mxu1 %v4820_v21  ;;  %v824_v17 = vpop.f32.mrb[28].mxu0  ;;  %v873_v18 = vpop.f32.mrb[28].mxu1 }
 0x112   :  { %v788_v19 = vmax.f32 %v786_v16, 0.0  ;;  %4115 = vmatprep.subr.bf16.mxu0 %v4502_v0  ;;  %4131 = vmatprep.subr.bf16.mxu1 %v4502_v0  ;;  %v4005_v20 = vpop.f32.mrb[29].mxu0  ;;  %v874_v22 = vadd.f32 %v873_v18, %v824_v17  ;;  %v4011_v31 = vpop.f32.mrb[29].mxu1 }
 0x113   :  { %v827_v33 = vpop.f32.mrb[30].mxu0  ;;  %v876_v34 = vpop.f32.mrb[30].mxu1 }
 0x114   :  { %v789_v36 = vpack.c.bf16 %v788_v19, %v787_v15  ;;  %4100 = vmatmul.mubr.msk.bf16.vlgmr.msra.gmra.mrb[56].mxu0 %vm1279_vm3, %v4840_v44  ;;  %v4006_v37 = vpop.f32.mrb[31].mxu0  ;;  %v877_v38 = vadd.f32 %v876_v34, %v827_v33  ;;  %v4012_v39 = vpop.f32.mrb[31].mxu1 }
 0x115   :  { %4116 = vmatpush3.bf16.msra.mxu0 %v4750_v24  ;;  %4132 = vmatpush3.bf16.msra.mxu1 %v4835_v35  ;;  %v4987_v37 = vld [vmem:[%s5613_s5 + $0x124] ss:$8 sps:$4 sm:$0xff]   ;;  %v4995_v39 = vld [vmem:[%s5613_s5 + $0x120] ss:$8 sps:$4 sm:$0xff]  }
 0x116   :  { %4117 = vmatprep.subr.bf16.mxu0 %v4502_v0  ;;  %4133 = vmatprep.subr.bf16.mxu1 %v4502_v0 }
 0x117   :  { %4123 = vmatprep.mubr.msk.bf16.mxu0 %vm4503_vm2, %v4502_v0 }
 0x119   :  { %4118 = vmatpush3.bf16.msra.mxu0 %v4764_v26  ;;  %4134 = vmatpush3.bf16.msra.mxu1 %v4846_v49  ;;  %v922_v40 = vpop.f32.mrb[32].mxu0  ;;  %v970_v41 = vpop.f32.mrb[32].mxu1 }
 0x11a   :  { %4119 = vmatprep.subr.bf16.mxu0 %v4502_v0  ;;  %4151 = vmatprep.subr.bf16.mxu1 %v4502_v0  ;;  %v929_v42 = vadd.f32 %v922_v40, %v874_v22  ;;  %v4017_v43 = vpop.f32.mrb[33].mxu0  ;;  %v4023_v44 = vpop.f32.mrb[33].mxu1  ;;  %v4253_v40 = vld [vmem:[%s5613_s5 + $0x20] ss:$8 sps:$4 sm:$0xff]  }
 0x11b   :  { %v925_v45 = vpop.f32.mrb[34].mxu0  ;;  %v973_v46 = vpop.f32.mrb[34].mxu1  ;;  %v5013_v43 = vld [vmem:[%s5613_s5 + $0x130] ss:$8 sps:$4 sm:$0xff]  }
 0x11c   :  { %4136 = vmatmul.mubr.msk.bf16.vlgmr.msra.gmra.mrb[52].mxu1 %vm1279_vm3, %v789_v36  ;;  %v931_v47 = vadd.f32 %v4801_v32, %v929_v42  ;;  %v930_v50 = vadd.f32 %v925_v45, %v877_v38  ;;  %v4018_v51 = vpop.f32.mrb[35].mxu0  ;;  %v4024_v52 = vpop.f32.mrb[35].mxu1  ;;  %v4247_v36 = vld [vmem:[%s5613_s5 + $0x10] ss:$8 sps:$4 sm:$0xff]   ;;  %v4255_v38 = vld [vmem:[%s5613_s5 + $0x24] ss:$8 sps:$4 sm:$0xff]  }
 0x11d   :  { %4120 = vmatpush3.bf16.msra.mxu0 %v4778_v28  ;;  %4152 = vmatpush3.bf16.msra.mxu1 %v4750_v24  ;;  %v4261_v42 = vld [vmem:[%s5613_s5 + $0x34] ss:$8 sps:$4 sm:$0xff]   ;;  %v4259_v44 = vld [vmem:[%s5613_s5 + $0x30] ss:$8 sps:$4 sm:$0xff]   ;;  %v5023_v45 = vld [vmem:[%s5613_s5 + $0x144] ss:$8 sps:$4 sm:$0xff]  }
 0x11e   :  { %4121 = vmatprep.subr.bf16.mxu0 %v4502_v0  ;;  %4153 = vmatprep.subr.bf16.mxu1 %v4502_v0  ;;  %v933_v53 = vmax.f32 %v931_v47, 0.0  ;;  %v932_v54 = vadd.f32 %v4801_v32, %v930_v50  ;;  %v5031_v47 = vld [vmem:[%s5613_s5 + $0x140] ss:$8 sps:$4 sm:$0xff]   ;;  %v5041_v51 = vld [vmem:[%s5613_s5 + $0x154] ss:$8 sps:$4 sm:$0xff]  }
 0x11f   :  { %4159 = vmatprep.mubr.msk.bf16.mxu1 %vm4503_vm2, %v4502_v0  ;;  %v4265_v50 = vld [vmem:[%s5613_s5 + $0x40] ss:$8 sps:$4 sm:$0xff]   ;;  %v4273_v52 = vld [vmem:[%s5613_s5 + $0x54] ss:$8 sps:$4 sm:$0xff]  }
 0x120   :  { %v934_v55 = vmax.f32 %v932_v54, 0.0  ;;  %v4271_v54 = vld [vmem:[%s5613_s5 + $0x50] ss:$8 sps:$4 sm:$0xff]  }
 0x121   :  { %4122 = vmatpush3.bf16.msra.mxu0 %v4792_v30  ;;  %4154 = vmatpush3.bf16.msra.mxu1 %v4764_v26  ;;  %v1019_v56 = vpop.f32.mrb[36].mxu0  ;;  %v1068_v57 = vpop.f32.mrb[36].mxu1 }
 0x122   :  { %v935_v58 = vpack.c.bf16 %v934_v55, %v933_v53  ;;  %4139 = vmatprep.subr.bf16.mxu0 %v4502_v0  ;;  %4155 = vmatprep.subr.bf16.mxu1 %v4502_v0  ;;  %v1020_v24 = vadd.f32 %v1019_v56, %v970_v41  ;;  %v4029_v59 = vpop.f32.mrb[37].mxu0  ;;  %v4035_v60 = vpop.f32.mrb[37].mxu1  ;;  %v5005_v41 = vld [vmem:[%s5613_s5 + $0x134] ss:$8 sps:$4 sm:$0xff]   ;;  %v5049_v53 = vld [vmem:[%s5613_s5 + $0x150] ss:$8 sps:$4 sm:$0xff]  }
 0x123   :  { %v1022_v61 = vpop.f32.mrb[38].mxu0  ;;  %v1071_v62 = vpop.f32.mrb[38].mxu1  ;;  %v5059_v55 = vld [vmem:[%s5613_s5 + $0x164] ss:$8 sps:$4 sm:$0xff]   ;;  %v4285_v59 = vld [vmem:[%s5613_s5 + $0x74] ss:$8 sps:$4 sm:$0xff]  }
 0x124   :  { %4124 = vmatmul.mubr.msk.bf16.vlgmr.msra.gmra.mrb[60].mxu0 %vm1279_vm3, %v4864_v3  ;;  %v1023_v63 = vadd.f32 %v1022_v61, %v973_v46  ;;  %v1075_v1 = vadd.f32 %v1068_v57, %v1020_v24  ;;  %v4030_v2 = vpop.f32.mrb[39].mxu0  ;;  %v4036_v48 = vpop.f32.mrb[39].mxu1  ;;  %v4267_v46 = vld [vmem:[%s5613_s5 + $0x44] ss:$8 sps:$4 sm:$0xff]   ;;  %v5067_v57 = vld [vmem:[%s5613_s5 + $0x160] ss:$8 sps:$4 sm:$0xff]  }
 0x125   :  { %4140 = vmatpush3.bf16.msra.mxu0 %v4745_v23  ;;  %4156 = vmatpush3.bf16.msra.mxu1 %v4778_v28  ;;  %v4279_v56 = vld [vmem:[%s5613_s5 + $0x64] ss:$8 sps:$4 sm:$0xff]   ;;  %v5077_v24 = vld [vmem:[%s5613_s5 + $0x174] ss:$8 sps:$4 sm:$0xff]   ;;  %v5085_v60 = vld [vmem:[%s5613_s5 + $0x170] ss:$8 sps:$4 sm:$0xff]  }
 0x126   :  { %4141 = vmatprep.subr.bf16.mxu0 %v4502_v0  ;;  %4157 = vmatprep.subr.bf16.mxu1 %v4502_v0  ;;  %v1077_v26 = vadd.f32 %v4801_v32, %v1075_v1  ;;  %v1076_v4 = vadd.f32 %v1071_v62, %v1023_v63  ;;  %v4283_v61 = vld [vmem:[%s5613_s5 + $0x70] ss:$8 sps:$4 sm:$0xff]   ;;  %v4288_v62 = vld [vmem:[%s5613_s5 + $0x84] ss:$8 sps:$4 sm:$0xff]   ;;  %v4504_v63 = vmov 0  }
 0x127   :  { %4147 = vmatprep.mubr.msk.bf16.mxu0 %vm4503_vm2, %v4502_v0 }
 0x128   :  { %v1079_v5 = vmax.f32 %v1077_v26, 0.0  ;;  %v1078_v3 = vadd.f32 %v4801_v32, %v1076_v4 }
 0x129   :  { %4142 = vmatpush3.bf16.msra.mxu0 %v4756_v25  ;;  %4158 = vmatpush3.bf16.msra.mxu1 %v4792_v30  ;;  %v1116_v6 = vpop.f32.mrb[40].mxu0  ;;  %v1165_v7 = vpop.f32.mrb[40].mxu1 }
 0x12a   :  { %4143 = vmatprep.subr.bf16.mxu0 %v4502_v0  ;;  %4175 = vmatprep.subr.bf16.mxu1 %v4502_v0  ;;  %v1080_v28 = vmax.f32 %v1078_v3, 0.0  ;;  %v4041_v9 = vpop.f32.mrb[41].mxu0  ;;  %v1166_v10 = vadd.f32 %v1165_v7, %v1116_v6  ;;  %v4047_v11 = vpop.f32.mrb[41].mxu1  ;;  %v5100_v7 = vld [vmem:[%s5615_s4] ss:$0 sm:$0xff] }
 0x12b   :  { %v1119_v12 = vpop.f32.mrb[42].mxu0  ;;  %v1168_v13 = vpop.f32.mrb[42].mxu1 }
 0x12c   :  { %4160 = vmatmul.mubr.msk.bf16.vlgmr.msra.gmra.mrb[56].mxu1 %vm1279_vm3, %v935_v58  ;;  %v1081_v14 = vpack.c.bf16 %v1080_v28, %v1079_v5  ;;  %v4042_v15 = vpop.f32.mrb[43].mxu0  ;;  %v1169_v16 = vadd.f32 %v1168_v13, %v1119_v12  ;;  %v4048_v17 = vpop.f32.mrb[43].mxu1 }
 0x12d   :  { %4144 = vmatpush3.bf16.msra.mxu0 %v4772_v27  ;;  %4176 = vmatpush3.bf16.msra.mxu1 %v4745_v23 }
 0x12e   :  { %4145 = vmatprep.subr.bf16.mxu0 %v4502_v0  ;;  %4177 = vmatprep.subr.bf16.mxu1 %v4502_v0 }
 0x12f   :  { %4183 = vmatprep.mubr.msk.bf16.mxu1 %vm4503_vm2, %v4502_v0 }
 0x131   :  { %4146 = vmatpush3.bf16.msra.mxu0 %v4786_v29  ;;  %v1214_v30 = vpop.f32.mrb[44].mxu0  ;;  %4178 = vmatpush3.bf16.msra.mxu1 %v4756_v25 }
 0x132   :  { %4163 = vmatprep.subr.bf16.mxu0 %v4502_v0  ;;  %v1221_v18 = vadd.f32 %v1214_v30, %v1166_v10  ;;  %v4053_v19 = vpop.f32.mrb[45].mxu0  ;;  %4179 = vmatprep.subr.bf16.mxu1 %v4502_v0 }
 0x133   :  { %v1217_v20 = vpop.f32.mrb[46].mxu0 }
 0x134   :  { %4148 = vmatmul.mubr.msk.bf16.vlgmr.msra.gmra.mrb[64].mxu0 %vm1279_vm3, %v935_v58  ;;  %v1223_v23 = vadd.f32 %v4801_v32, %v1221_v18  ;;  %v1222_v22 = vadd.f32 %v1217_v20, %v1169_v16  ;;  %v4054_v31 = vpop.f32.mrb[47].mxu0  ;;  %v4277_v58 = vld [vmem:[%s5613_s5 + $0x60] ss:$8 sps:$4 sm:$0xff]  }
 0x135   :  { %4164 = vmatpush3.bf16.msra.mxu0 %v4812_v8  ;;  %4180 = vmatpush3.bf16.msra.mxu1 %v4772_v27  ;;  %v4951_v27 = vld [vmem:[%s5613_s5 + $0x100] ss:$8 sps:$4 sm:$0xff]  }
 0x136   :  { %4165 = vmatprep.subr.bf16.mxu0 %v4502_v0  ;;  %v1225_v25 = vmax.f32 %v1223_v23, 0.0  ;;  %v1224_v33 = vadd.f32 %v4801_v32, %v1222_v22  ;;  %4181 = vmatprep.subr.bf16.mxu1 %v4502_v0  ;;  %v4241_v32 = vld [vmem:[%s5613_s5] ss:$8 sps:$4 sm:$0xff]  }
 0x137   :  { %4171 = vmatprep.mubr.msk.bf16.mxu0 %vm4503_vm2, %v4502_v0 }
 0x138   :  { %v1226_v34 = vmax.f32 %v1224_v33, 0.0 }
 0x139   :  { %4166 = vmatpush3.bf16.msra.mxu0 %v4820_v21  ;;  %4182 = vmatpush3.bf16.msra.mxu1 %v4786_v29  ;;  %v4956_v29 = vld [vmem:[%s5613_s5 + $0x104] ss:$8 sps:$4 sm:$0xff]   ;;  %v4969_v21 = vld [vmem:[%s5613_s5 + $0x114] ss:$8 sps:$4 sm:$0xff]  }
 0x13a   :  { %4167 = vmatprep.subr.bf16.mxu0 %v4502_v0  ;;  %v1227_v8 = vpack.c.bf16 %v1226_v34, %v1225_v25 }
 0x13c   :  { %4184 = vmatmul.mubr.msk.bf16.vlgmr.msra.gmra.mrb[60].mxu1 %vm1279_vm3, %v1227_v8 }
 0x13d   :  { %4168 = vmatpush3.bf16.msra.mxu0 %v4835_v35  ;;  %v4249_v35 = vld [vmem:[%s5613_s5 + $0x14] ss:$8 sps:$4 sm:$0xff]   ;;  %2265 = vmatprep.mubr.bf16.mxu1 %v4504_v63 }
 0x13e   :  { %4169 = vmatprep.subr.bf16.mxu0 %v4502_v0  ;;  %v4243_v0 = vld [vmem:[%s5613_s5 + $0x4] ss:$8 sps:$4 sm:$0xff]  }
 0x13f   :  { %2233 = vmatprep.subr.bf16.mxu1 %v4243_v0 }
 0x140   :  { %2234 = vmatpush1.bf16.msra.mxu1 %v4241_v32 }
 0x141   :  { %4170 = vmatpush3.bf16.msra.mxu0 %v4846_v49  ;;  %v4977_v49 = vld [vmem:[%s5613_s5 + $0x110] ss:$8 sps:$4 sm:$0xff]   ;;  %2235 = vmatprep.subr.bf16.mxu1 %v4249_v35 }
 0x142   :  { %1966 = vmatprep.subr.bf16.mxu0 %v4956_v29 }
 0x144   :  { %4172 = vmatmul.mubr.msk.bf16.vlgmr.msra.gmra.mrb[68].mxu0 %vm1279_vm3, %v1081_v14  ;;  %2236 = vmatpush1.bf16.msra.mxu1 %v4247_v36 }
 0x145   :  { %1967 = vmatpush1.bf16.msra.mxu0 %v4951_v27  ;;  %2237 = vmatprep.subr.bf16.mxu1 %v4255_v38 }
 0x146   :  { %1968 = vmatprep.subr.bf16.mxu0 %v4969_v21  ;;  %1998 = vmatprep.mubr.bf16.mxu0 %v4504_v63 }
 0x148   :  { %2238 = vmatpush1.bf16.msra.mxu1 %v4253_v40 }
 0x149   :  { %1969 = vmatpush1.bf16.msra.mxu0 %v4977_v49  ;;  %2239 = vmatprep.subr.bf16.mxu1 %v4261_v42 }
 0x14a   :  { %1970 = vmatprep.subr.bf16.mxu0 %v4987_v37 }
 0x14c   :  { %2240 = vmatpush1.bf16.msra.mxu1 %v4259_v44 }
 0x14d   :  { %1971 = vmatpush1.bf16.msra.mxu0 %v4995_v39  ;;  %2241 = vmatprep.subr.bf16.mxu1 %v4267_v46  ;;  %v4286_v46 = vld [vmem:[%s5613_s5 + $0x80] ss:$8 sps:$4 sm:$0xff]  }
 0x14e   :  { %1972 = vmatprep.subr.bf16.mxu0 %v5005_v41 }
 0x150   :  { %2242 = vmatpush1.bf16.msra.mxu1 %v4265_v50 }
 0x151   :  { %1973 = vmatpush1.bf16.msra.mxu0 %v5013_v43  ;;  %2243 = vmatprep.subr.bf16.mxu1 %v4273_v52 }
 0x152   :  { %1974 = vmatprep.subr.bf16.mxu0 %v5023_v45 }
 0x154   :  { %2244 = vmatpush1.bf16.msra.mxu1 %v4271_v54  ;;  %v4291_v54 = vld [vmem:[%s5613_s5 + $0x94] ss:$8 sps:$4 sm:$0xff]  }
 0x155   :  { %1975 = vmatpush1.bf16.msra.mxu0 %v5031_v47  ;;  %2245 = vmatprep.subr.bf16.mxu1 %v4279_v56 }
 0x156   :  { %1976 = vmatprep.subr.bf16.mxu0 %v5041_v51 }
 0x158   :  { %2246 = vmatpush1.bf16.msra.mxu1 %v4277_v58  ;;  %v4289_v58 = vld [vmem:[%s5613_s5 + $0x90] ss:$8 sps:$4 sm:$0xff]  }
 0x159   :  { %1977 = vmatpush1.bf16.msra.mxu0 %v5049_v53  ;;  %2247 = vmatprep.subr.bf16.mxu1 %v4285_v59  ;;  %v4294_v59 = vld [vmem:[%s5613_s5 + $0xa4] ss:$8 sps:$4 sm:$0xff]  }
 0x15a   :  { %1978 = vmatprep.subr.bf16.mxu0 %v5059_v55 }
 0x15c   :  { %2248 = vmatpush1.bf16.msra.mxu1 %v4283_v61 }
 0x15d   :  { %1979 = vmatpush1.bf16.msra.mxu0 %v5067_v57  ;;  %2276 = vmatprep.subr.bf16.mxu1 %v4288_v62 }
 0x15e   :  { %1980 = vmatprep.subr.bf16.mxu0 %v5077_v24 }
 0x161   :  { %1981 = vmatpush1.bf16.msra.mxu0 %v5085_v60 }
 0x162   :  { %2089 = vmatprep.subr.bf16.mxu0 %v4288_v62 }
 0x1c7   :  { %v1317_v1 = vpop.f32.mrb[48].mxu0  ;;  %v1461_v2 = vpop.f32.mrb[44].mxu1 }
 0x1c8   :  { %v4065_v48 = vpop.f32.mrb[49].mxu0  ;;  %v4089_v26 = vpop.f32.mrb[45].mxu1 }
 0x1c9   :  { %v1320_v4 = vpop.f32.mrb[50].mxu0  ;;  %v1464_v5 = vpop.f32.mrb[46].mxu1  ;;  %v4292_v48 = vld [vmem:[%s5613_s5 + $0xa0] ss:$8 sps:$4 sm:$0xff]  }
 0x1ca   :  { %v4066_v3 = vpop.f32.mrb[51].mxu0  ;;  %v4090_v6 = vpop.f32.mrb[47].mxu1 }
 0x1cb   :  { %v4295_v3 = vld [vmem:[%s5613_s5 + $0xb0] ss:$8 sps:$4 sm:$0xff]   ;;  %v4300_v6 = vld [vmem:[%s5613_s5 + $0xc4] ss:$8 sps:$4 sm:$0xff]  }
 0x1d7   :  { %v1385_v28 = vpop.f32.mrb[52].mxu0 }
 0x1d8   :  { %v1386_v9 = vadd.f32 %v1385_v28, %v1317_v1  ;;  %v4077_v10 = vpop.f32.mrb[53].mxu0 }
 0x1d9   :  { %v1388_v11 = vpop.f32.mrb[54].mxu0 }
 0x1da   :  { %v1398_v12 = vadd.f32 %v5100_v7, %v1386_v9  ;;  %v1389_v13 = vadd.f32 %v1388_v11, %v1320_v4  ;;  %v4078_v14 = vpop.f32.mrb[55].mxu0  ;;  %v4298_v11 = vld [vmem:[%s5613_s5 + $0xc0] ss:$8 sps:$4 sm:$0xff]  }
 0x1db   :  { %v4301_v14 = vld [vmem:[%s5613_s5 + $0xd0] ss:$8 sps:$4 sm:$0xff]  }
 0x1dc   :  { %v1399_v15 = vadd.f32 %v5100_v7, %v1389_v13  ;;  %v1400_v16 = vmax.f32 %v1398_v12, 0.0  ;;  %v4303_v13 = vld [vmem:[%s5613_s5 + $0xd4] ss:$8 sps:$4 sm:$0xff]  }
 0x1de   :  { %v1401_v17 = vmax.f32 %v1399_v15, 0.0  ;;  %v4306_v15 = vld [vmem:[%s5613_s5 + $0xe4] ss:$8 sps:$4 sm:$0xff]  }
 0x1df   :  { %v1549_v30 = vpop.f32.mrb[48].mxu1 }
 0x1e0   :  { %v5104_v18 = vpack.c.bf16 %v1401_v17, %v1400_v16  ;;  %v4113_v19 = vpop.f32.mrb[49].mxu1 }
 0x1e1   :  { %v1552_v20 = vpop.f32.mrb[50].mxu1 }
 0x1e2   :  { %v4114_v23 = vpop.f32.mrb[51].mxu1 }
 0x1e7   :  { %v1505_v22 = vpop.f32.mrb[56].mxu0 }
 0x1e8   :  { %v1506_v31 = vadd.f32 %v1505_v22, %v1461_v2  ;;  %v4101_v25 = vpop.f32.mrb[57].mxu0 }
 0x1e9   :  { %v1508_v33 = vpop.f32.mrb[58].mxu0  ;;  %v4309_v25 = vld [vmem:[%s5613_s5 + $0xf4] ss:$8 sps:$4 sm:$0xff]  }
 0x1ea   :  { %v1556_v34 = vadd.f32 %v1549_v30, %v1506_v31  ;;  %v1509_v8 = vadd.f32 %v1508_v33, %v1464_v5  ;;  %v4102_v32 = vpop.f32.mrb[59].mxu0  ;;  %v4297_v5 = vld [vmem:[%s5613_s5 + $0xb4] ss:$8 sps:$4 sm:$0xff]  }
 0x1ec   :  { %v1558_v0 = vadd.f32 %v5100_v7, %v1556_v34  ;;  %v1557_v35 = vadd.f32 %v1552_v20, %v1509_v8  ;;  %v4304_v20 = vld [vmem:[%s5613_s5 + $0xe0] ss:$8 sps:$4 sm:$0xff]   ;;  %v4307_v34 = vld [vmem:[%s5613_s5 + $0xf0] ss:$8 sps:$4 sm:$0xff]  }
 0x1ee   :  { %v1559_v36 = vadd.f32 %v5100_v7, %v1557_v35  ;;  %v1560_v40 = vmax.f32 %v1558_v0, 0.0  ;;  %v4312_v0 = vld [vmem:[%s5614_s7 + $0x404] ss:$16 sps:$4 sm:$0xff]  }
 0x1ef   :  { %v1641_v38 = vpop.f32.mrb[52].mxu1 }
 0x1f0   :  { %v1561_v42 = vmax.f32 %v1559_v36, 0.0  ;;  %v4137_v44 = vpop.f32.mrb[53].mxu1 }
 0x1f1   :  { %v1644_v50 = vpop.f32.mrb[54].mxu1  ;;  %v4310_v44 = vld [vmem:[%s5614_s7 + $0x400] ss:$16 sps:$4 sm:$0xff]  }
 0x1f2   :  { %v1562_v52 = vpack.c.bf16 %v1561_v42, %v1560_v40  ;;  %v4138_v56 = vpop.f32.mrb[55].mxu1 }
 0x1f4   :  { %1999 = vmatmul.mubr.bf16.vlgmr.msra.gmra.mrb[72].mxu0 %v1562_v52  ;;  %2266 = vmatmul.mubr.bf16.vlgmr.msra.gmra.mrb[64].mxu1 %v1562_v52  ;;  %v4324_v52 = vld [vmem:[%s5614_s7 + $0x444] ss:$16 sps:$4 sm:$0xff]  }
 0x1f5   :  { %2090 = vmatpush1.bf16.msra.mxu0 %v4286_v46  ;;  %2277 = vmatpush1.bf16.msra.mxu1 %v4286_v46  ;;  %v4318_v46 = vld [vmem:[%s5614_s7 + $0x424] ss:$16 sps:$4 sm:$0xff]  }
 0x1f6   :  { %2091 = vmatprep.subr.bf16.mxu0 %v4291_v54  ;;  %2278 = vmatprep.subr.bf16.mxu1 %v4291_v54 }
 0x1f7   :  { %v1597_v61 = vpop.f32.mrb[60].mxu0  ;;  %2121 = vmatprep.mubr.bf16.mxu0 %v4504_v63  ;;  %2308 = vmatprep.mubr.bf16.mxu1 %v4504_v63 }
 0x1f8   :  { %v1642_v62 = vadd.f32 %v1641_v38, %v1597_v61  ;;  %v4125_v1 = vpop.f32.mrb[61].mxu0 }
 0x1f9   :  { %2092 = vmatpush1.bf16.msra.mxu0 %v4289_v58  ;;  %2279 = vmatpush1.bf16.msra.mxu1 %v4289_v58  ;;  %v1600_v2 = vpop.f32.mrb[62].mxu0  ;;  %v4336_v1 = vld [vmem:[%s5614_s7 + $0x484] ss:$16 sps:$4 sm:$0xff]  }
 0x1fa   :  { %v1645_v26 = vadd.f32 %v1644_v50, %v1600_v2  ;;  %v4126_v4 = vpop.f32.mrb[63].mxu0  ;;  %2093 = vmatprep.subr.bf16.mxu0 %v4294_v59  ;;  %2280 = vmatprep.subr.bf16.mxu1 %v4294_v59  ;;  %v4330_v59 = vld [vmem:[%s5614_s7 + $0x464] ss:$16 sps:$4 sm:$0xff]  }
 0x1fb   :  { %v4337_v4 = vld [vmem:[%s5614_s7 + $0x488] ss:$16 sps:$4 sm:$0xff]  }
 0x1fd   :  { %2094 = vmatpush1.bf16.msra.mxu0 %v4292_v48  ;;  %2281 = vmatpush1.bf16.msra.mxu1 %v4292_v48 }
 0x1fe   :  { %2095 = vmatprep.subr.bf16.mxu0 %v4297_v5  ;;  %2282 = vmatprep.subr.bf16.mxu1 %v4297_v5  ;;  %v4345_v5 = vld [vmem:[%s5614_s7 + $0x4ac] ss:$16 sps:$4 sm:$0xff]  }
 0x1ff   :  { %v1733_v28 = vpop.f32.mrb[56].mxu1 }
 0x200   :  { %v4161_v9 = vpop.f32.mrb[57].mxu1 }
 0x201   :  { %2096 = vmatpush1.bf16.msra.mxu0 %v4295_v3  ;;  %2283 = vmatpush1.bf16.msra.mxu1 %v4295_v3  ;;  %v1736_v10 = vpop.f32.mrb[58].mxu1  ;;  %v4343_v3 = vld [vmem:[%s5614_s7 + $0x4a8] ss:$16 sps:$4 sm:$0xff]   ;;  %v4346_v9 = vld [vmem:[%s5614_s7 + $0x4c0] ss:$16 sps:$4 sm:$0xff]  }
 0x202   :  { %v4162_v12 = vpop.f32.mrb[59].mxu1  ;;  %2097 = vmatprep.subr.bf16.mxu0 %v4300_v6  ;;  %2284 = vmatprep.subr.bf16.mxu1 %v4300_v6  ;;  %v4348_v6 = vld [vmem:[%s5614_s7 + $0x4c4] ss:$16 sps:$4 sm:$0xff]  }
 0x203   :  { %v4357_v12 = vld [vmem:[%s5614_s7 + $0x4ec] ss:$16 sps:$4 sm:$0xff]  }
 0x205   :  { %2098 = vmatpush1.bf16.msra.mxu0 %v4298_v11  ;;  %2285 = vmatpush1.bf16.msra.mxu1 %v4298_v11  ;;  %v4354_v11 = vld [vmem:[%s5614_s7 + $0x4e4] ss:$16 sps:$4 sm:$0xff]  }
 0x206   :  { %2099 = vmatprep.subr.bf16.mxu0 %v4303_v13  ;;  %2286 = vmatprep.subr.bf16.mxu1 %v4303_v13  ;;  %v4352_v13 = vld [vmem:[%s5614_s7 + $0x4e0] ss:$16 sps:$4 sm:$0xff]  }
 0x207   :  { %v1685_v16 = vpop.f32.mrb[64].mxu0 }
 0x208   :  { %v1692_v17 = vadd.f32 %v1685_v16, %v1642_v62  ;;  %v4149_v30 = vpop.f32.mrb[65].mxu0  ;;  %v4360_v16 = vld [vmem:[%s5614_s7 + $0x504] ss:$16 sps:$4 sm:$0xff]  }
 0x209   :  { %2100 = vmatpush1.bf16.msra.mxu0 %v4301_v14  ;;  %2287 = vmatpush1.bf16.msra.mxu1 %v4301_v14  ;;  %v1688_v19 = vpop.f32.mrb[66].mxu0  ;;  %v4355_v14 = vld [vmem:[%s5614_s7 + $0x4e8] ss:$16 sps:$4 sm:$0xff]   ;;  %v4363_v30 = vld [vmem:[%s5614_s7 + $0x50c] ss:$16 sps:$4 sm:$0xff]  }
 0x20a   :  { %v1694_v23 = vadd.f32 %v5100_v7, %v1692_v17  ;;  %v1693_v22 = vadd.f32 %v1688_v19, %v1645_v26  ;;  %v4150_v31 = vpop.f32.mrb[67].mxu0  ;;  %2101 = vmatprep.subr.bf16.mxu0 %v4306_v15  ;;  %2288 = vmatprep.subr.bf16.mxu1 %v4306_v15  ;;  %v4358_v15 = vld [vmem:[%s5614_s7 + $0x500] ss:$16 sps:$4 sm:$0xff]   ;;  %v4361_v17 = vld [vmem:[%s5614_s7 + $0x508] ss:$16 sps:$4 sm:$0xff]  }
 0x20b   :  { %v4366_v19 = vld [vmem:[%s5614_s7 + $0x524] ss:$16 sps:$4 sm:$0xff]  }
 0x20c   :  { %v1695_v33 = vadd.f32 %v5100_v7, %v1693_v22  ;;  %v1696_v8 = vmax.f32 %v1694_v23, 0.0  ;;  %v4364_v23 = vld [vmem:[%s5614_s7 + $0x520] ss:$16 sps:$4 sm:$0xff]   ;;  %v4367_v22 = vld [vmem:[%s5614_s7 + $0x528] ss:$16 sps:$4 sm:$0xff]  }
 0x20d   :  { %2102 = vmatpush1.bf16.msra.mxu0 %v4304_v20  ;;  %2289 = vmatpush1.bf16.msra.mxu1 %v4304_v20  ;;  %v4369_v20 = vld [vmem:[%s5614_s7 + $0x52c] ss:$16 sps:$4 sm:$0xff]   ;;  %v4372_v31 = vld [vmem:[%s5614_s7 + $0x544] ss:$16 sps:$4 sm:$0xff]  }
 0x20e   :  { %v1697_v32 = vmax.f32 %v1695_v33, 0.0  ;;  %2103 = vmatprep.subr.bf16.mxu0 %v4309_v25  ;;  %2290 = vmatprep.subr.bf16.mxu1 %v4309_v25  ;;  %v4375_v25 = vld [vmem:[%s5614_s7 + $0x54c] ss:$16 sps:$4 sm:$0xff]   ;;  %v4370_v33 = vld [vmem:[%s5614_s7 + $0x540] ss:$16 sps:$4 sm:$0xff]  }
 0x20f   :  { %v1821_v35 = vpop.f32.mrb[60].mxu1 }
 0x210   :  { %v1698_v36 = vpack.c.bf16 %v1697_v32, %v1696_v8  ;;  %v4185_v38 = vpop.f32.mrb[61].mxu1  ;;  %v4378_v8 = vld [vmem:[%s5614_s7 + $0x564] ss:$16 sps:$4 sm:$0xff]   ;;  %v4381_v32 = vld [vmem:[%s5614_s7 + $0x56c] ss:$16 sps:$4 sm:$0xff]  }
 0x211   :  { %2104 = vmatpush1.bf16.msra.mxu0 %v4307_v34  ;;  %2291 = vmatpush1.bf16.msra.mxu1 %v4307_v34  ;;  %v1824_v40 = vpop.f32.mrb[62].mxu1  ;;  %v4373_v34 = vld [vmem:[%s5614_s7 + $0x548] ss:$16 sps:$4 sm:$0xff]   ;;  %v4387_v38 = vld [vmem:[%s5614_s7 + $0x58c] ss:$16 sps:$4 sm:$0xff]  }
 0x212   :  { %2319 = vmatprep.subr.bf16.mxu1 %v4956_v29  ;;  %v4186_v42 = vpop.f32.mrb[63].mxu1  ;;  %2827 = vmatprep.subr.bf16.mxu0 %v4312_v0  ;;  %v4316_v29 = vld [vmem:[%s5614_s7 + $0x420] ss:$16 sps:$4 sm:$0xff]  }
 0x213   :  { %v4376_v0 = vld [vmem:[%s5614_s7 + $0x560] ss:$16 sps:$4 sm:$0xff]   ;;  %v4385_v42 = vld [vmem:[%s5614_s7 + $0x588] ss:$16 sps:$4 sm:$0xff]  }
 0x214   :  { %2122 = vmatmul.mubr.bf16.vlgmr.msra.gmra.mrb[72].mxu0 %v5104_v18  ;;  %2309 = vmatmul.mubr.bf16.vlgmr.msra.gmra.mrb[64].mxu1 %v1698_v36  ;;  %v4384_v36 = vld [vmem:[%s5614_s7 + $0x584] ss:$16 sps:$4 sm:$0xff]  }
 0x215   :  { %2320 = vmatpush1.bf16.msra.mxu1 %v4951_v27  ;;  %2351 = vmatprep.mubr.bf16.mxu1 %v4504_v63 }
 0x216   :  { %2321 = vmatprep.subr.bf16.mxu1 %v4969_v21  ;;  %2828 = vmatpush1.bf16.msra.mxu0 %v4310_v44  ;;  %v4322_v21 = vld [vmem:[%s5614_s7 + $0x440] ss:$16 sps:$4 sm:$0xff]   ;;  %v4390_v44 = vld [vmem:[%s5614_s7 + $0x5a4] ss:$16 sps:$4 sm:$0xff]  }
 0x217   :  { %v1777_v50 = vpop.f32.mrb[68].mxu0  ;;  %2829 = vmatprep.subr.bf16.mxu0 %v4318_v46  ;;  %v4393_v46 = vld [vmem:[%s5614_s7 + $0x5ac] ss:$16 sps:$4 sm:$0xff]  }
 0x218   :  { %v1778_v54 = vadd.f32 %v1777_v50, %v1733_v28  ;;  %v4173_v18 = vpop.f32.mrb[69].mxu0  ;;  %v4351_v28 = vld [vmem:[%s5614_s7 + $0x4cc] ss:$16 sps:$4 sm:$0xff]   ;;  %v4391_v50 = vld [vmem:[%s5614_s7 + $0x5a8] ss:$16 sps:$4 sm:$0xff]  }
 0x219   :  { %2322 = vmatpush1.bf16.msra.mxu1 %v4977_v49  ;;  %v1780_v27 = vpop.f32.mrb[70].mxu0  ;;  %v4394_v18 = vld [vmem:[%s5614_s7 + $0x5c0] ss:$16 sps:$4 sm:$0xff]  }
 0x21a   :  { %v1781_v56 = vadd.f32 %v1780_v27, %v1736_v10  ;;  %v1828_v63 = vadd.f32 %v1821_v35, %v1778_v54  ;;  %v4174_v58 = vpop.f32.mrb[71].mxu0  ;;  %2323 = vmatprep.subr.bf16.mxu1 %v4987_v37  ;;  %2830 = vmatpush1.bf16.msra.mxu0 %v4316_v29  ;;  %v4328_v37 = vld [vmem:[%s5614_s7 + $0x460] ss:$16 sps:$4 sm:$0xff]   ;;  %v4349_v10 = vld [vmem:[%s5614_s7 + $0x4c8] ss:$16 sps:$4 sm:$0xff]  }
 0x21b   :  { %2831 = vmatprep.subr.bf16.mxu0 %v4324_v52  ;;  %v4379_v35 = vld [vmem:[%s5614_s7 + $0x568] ss:$16 sps:$4 sm:$0xff]   ;;  %v4388_v29 = vld [vmem:[%s5614_s7 + $0x5a0] ss:$16 sps:$4 sm:$0xff]   ;;  %v4396_v52 = vld [vmem:[%s5614_s7 + $0x5c4] ss:$16 sps:$4 sm:$0xff]  }
 0x21c   :  { %v1830_v61 = vadd.f32 %v5100_v7, %v1828_v63  ;;  %v1829_v62 = vadd.f32 %v1824_v40, %v1781_v56  ;;  %v4382_v40 = vld [vmem:[%s5614_s7 + $0x580] ss:$16 sps:$4 sm:$0xff]   ;;  %v4399_v54 = vld [vmem:[%s5614_s7 + $0x5cc] ss:$16 sps:$4 sm:$0xff]   ;;  %v4397_v27 = vld [vmem:[%s5614_s7 + $0x5c8] ss:$16 sps:$4 sm:$0xff]  }
 0x21d   :  { %2324 = vmatpush1.bf16.msra.mxu1 %v4995_v39  ;;  %v4334_v39 = vld [vmem:[%s5614_s7 + $0x480] ss:$16 sps:$4 sm:$0xff]   ;;  %v4402_v56 = vld [vmem:[%s5614_s7 + $0x5e4] ss:$16 sps:$4 sm:$0xff]   ;;  %v4405_v63 = vld [vmem:[%s5614_s7 + $0x5ec] ss:$16 sps:$4 sm:$0xff]  }
 0x21e   :  { %v1831_v49 = vadd.f32 %v5100_v7, %v1829_v62  ;;  %2325 = vmatprep.subr.bf16.mxu1 %v5005_v41  ;;  %2832 = vmatpush1.bf16.msra.mxu0 %v4322_v21  ;;  %v1832_v2 = vmax.f32 %v1830_v61, 0.0  ;;  %v4342_v41 = vld [vmem:[%s5614_s7 + $0x4a4] ss:$16 sps:$4 sm:$0xff]   ;;  %v4339_v7 = vld [vmem:[%s5614_s7 + $0x48c] ss:$16 sps:$4 sm:$0xff]   ;;  %v2133_v62 = vlaneseq }
 0x21f   :  { %2833 = vmatprep.subr.bf16.mxu0 %v4330_v59  ;;  %v4400_v58 = vld [vmem:[%s5614_s7 + $0x5e0] ss:$16 sps:$4 sm:$0xff]   ;;  %v4403_v21 = vld [vmem:[%s5614_s7 + $0x5e8] ss:$16 sps:$4 sm:$0xff]   ;;  %v4408_v59 = vld [vmem:[%s5614_s7 + $0x204] ss:$16 sps:$4 sm:$0xff]  }
 0x220   :  { %v1833_v48 = vmax.f32 %v1831_v49, 0.0  ;;  %v4411_v61 = vld [vmem:[%s5614_s7 + $0x20c] ss:$16 sps:$4 sm:$0xff]   ;;  %v5375_v49 = vshrl.u32 %v2133_v62, 7  ;;  %v4451_v62 = vld [vmem:[%s5614_s7 + $0x2e8] ss:$16 sps:$4 sm:$0xff]  }
 0x221   :  { %2326 = vmatpush1.bf16.msra.mxu1 %v5013_v43  ;;  %v4340_v43 = vld [vmem:[%s5614_s7 + $0x4a0] ss:$16 sps:$4 sm:$0xff]  }
 0x222   :  { %v1834_v26 = vpack.c.bf16 %v1833_v48, %v1832_v2  ;;  %2327 = vmatprep.subr.bf16.mxu1 %v5023_v45  ;;  %2834 = vmatpush1.bf16.msra.mxu0 %v4328_v37  ;;  %v4315_v45 = vld [vmem:[%s5614_s7 + $0x40c] ss:$16 sps:$4 sm:$0xff]   ;;  %v2135_v37 = vsub.s32 0, %v5375_v49  ;;  %v2139_v2 = vsub.s32 1, %v5375_v49 }
 0x223   :  { %2835 = vmatprep.subr.bf16.mxu0 %v4336_v1  ;;  %v1885_v1 = vld [vmem:[%s5616_s6] sm:$0x3] }
 0x224   :  { %v2136_v48 = vrot.slane %v1885_v1, %v2135_v37 }
 0x225   :  { %2328 = vmatpush1.bf16.msra.mxu1 %v5031_v47  ;;  %v4313_v47 = vld [vmem:[%s5614_s7 + $0x408] ss:$16 sps:$4 sm:$0xff]  }
 0x226   :  { %2329 = vmatprep.subr.bf16.mxu1 %v5041_v51  ;;  %2836 = vmatpush1.bf16.msra.mxu0 %v4334_v39  ;;  %v4321_v51 = vld [vmem:[%s5614_s7 + $0x42c] ss:$16 sps:$4 sm:$0xff]  }
 0x227   :  { %2837 = vmatprep.subr.bf16.mxu0 %v4342_v41 }
 0x229   :  { %2330 = vmatpush1.bf16.msra.mxu1 %v5049_v53  ;;  %v4319_v53 = vld [vmem:[%s5614_s7 + $0x428] ss:$16 sps:$4 sm:$0xff]  }
 0x22a   :  { %2331 = vmatprep.subr.bf16.mxu1 %v5059_v55  ;;  %2838 = vmatpush1.bf16.msra.mxu0 %v4340_v43  ;;  %v4327_v55 = vld [vmem:[%s5614_s7 + $0x44c] ss:$16 sps:$4 sm:$0xff]  }
 0x22b   :  { %2839 = vmatprep.subr.bf16.mxu0 %v4348_v6 }
 0x22d   :  { %2332 = vmatpush1.bf16.msra.mxu1 %v5067_v57  ;;  %v4325_v57 = vld [vmem:[%s5614_s7 + $0x448] ss:$16 sps:$4 sm:$0xff]  }
 0x22e   :  { %2333 = vmatprep.subr.bf16.mxu1 %v5077_v24  ;;  %v4333_v24 = vld [vmem:[%s5614_s7 + $0x46c] ss:$16 sps:$4 sm:$0xff]   ;;  %2840 = vmatpush1.bf16.msra.mxu0 %v4346_v9 }
 0x22f   :  { %2841 = vmatprep.subr.bf16.mxu0 %v4354_v11 }
 0x231   :  { %2334 = vmatpush1.bf16.msra.mxu1 %v5085_v60  ;;  %v4331_v60 = vld [vmem:[%s5614_s7 + $0x468] ss:$16 sps:$4 sm:$0xff]  }
 0x232   :  { %2870 = vmatprep.subr.bf16.mxu1 %v4315_v45  ;;  %2842 = vmatpush1.bf16.msra.mxu0 %v4352_v13 }
 0x233   :  { %2843 = vmatprep.subr.bf16.mxu0 %v4360_v16 }
 0x234   :  { %2352 = vmatmul.mubr.bf16.vlgmr.msra.gmra.mrb[64].mxu1 %v1834_v26  ;;  %v2140_v26 = vrot.slane %v1885_v1, %v2139_v2  ;;  %v4456_v1 = vld [vmem:[%s5614_s7 + $0x304] ss:$16 sps:$4 sm:$0xff]  }
 0x235   :  { %2871 = vmatpush1.bf16.msra.mxu1 %v4313_v47 }
 0x236   :  { %2872 = vmatprep.subr.bf16.mxu1 %v4321_v51  ;;  %2844 = vmatpush1.bf16.msra.mxu0 %v4358_v15 }
 0x237   :  { %2845 = vmatprep.subr.bf16.mxu0 %v4366_v19 }
 0x239   :  { %2873 = vmatpush1.bf16.msra.mxu1 %v4319_v53 }
 0x23a   :  { %2874 = vmatprep.subr.bf16.mxu1 %v4327_v55  ;;  %2846 = vmatpush1.bf16.msra.mxu0 %v4364_v23  ;;  %v4409_v23 = vld [vmem:[%s5614_s7 + $0x208] ss:$16 sps:$4 sm:$0xff]  }
 0x23b   :  { %2847 = vmatprep.subr.bf16.mxu0 %v4372_v31  ;;  %v4417_v31 = vld [vmem:[%s5614_s7 + $0x22c] ss:$16 sps:$4 sm:$0xff]  }
 0x23d   :  { %2875 = vmatpush1.bf16.msra.mxu1 %v4325_v57 }
 0x23e   :  { %2876 = vmatprep.subr.bf16.mxu1 %v4333_v24  ;;  %2848 = vmatpush1.bf16.msra.mxu0 %v4370_v33  ;;  %v4415_v33 = vld [vmem:[%s5614_s7 + $0x228] ss:$16 sps:$4 sm:$0xff]  }
 0x23f   :  { %2849 = vmatprep.subr.bf16.mxu0 %v4378_v8  ;;  %v4423_v8 = vld [vmem:[%s5614_s7 + $0x24c] ss:$16 sps:$4 sm:$0xff]  }
 0x241   :  { %2877 = vmatpush1.bf16.msra.mxu1 %v4331_v60 }
 0x242   :  { %2878 = vmatprep.subr.bf16.mxu1 %v4339_v7  ;;  %2850 = vmatpush1.bf16.msra.mxu0 %v4376_v0  ;;  %v4421_v0 = vld [vmem:[%s5614_s7 + $0x248] ss:$16 sps:$4 sm:$0xff]  }
 0x243   :  { %2851 = vmatprep.subr.bf16.mxu0 %v4384_v36  ;;  %v4429_v36 = vld [vmem:[%s5614_s7 + $0x26c] ss:$16 sps:$4 sm:$0xff]  }
 0x245   :  { %2879 = vmatpush1.bf16.msra.mxu1 %v4337_v4 }
 0x246   :  { %2880 = vmatprep.subr.bf16.mxu1 %v4345_v5  ;;  %2852 = vmatpush1.bf16.msra.mxu0 %v4382_v40  ;;  %v4427_v40 = vld [vmem:[%s5614_s7 + $0x268] ss:$16 sps:$4 sm:$0xff]  }
 0x247   :  { %2853 = vmatprep.subr.bf16.mxu0 %v4390_v44  ;;  %v4435_v44 = vld [vmem:[%s5614_s7 + $0x28c] ss:$16 sps:$4 sm:$0xff]  }
 0x249   :  { %2881 = vmatpush1.bf16.msra.mxu1 %v4343_v3 }
 0x24a   :  { %2882 = vmatprep.subr.bf16.mxu1 %v4351_v28  ;;  %2854 = vmatpush1.bf16.msra.mxu0 %v4388_v29  ;;  %v4433_v29 = vld [vmem:[%s5614_s7 + $0x288] ss:$16 sps:$4 sm:$0xff]  }
 0x24b   :  { %2855 = vmatprep.subr.bf16.mxu0 %v4396_v52  ;;  %v4441_v52 = vld [vmem:[%s5614_s7 + $0x2ac] ss:$16 sps:$4 sm:$0xff]  }
 0x24d   :  { %2883 = vmatpush1.bf16.msra.mxu1 %v4349_v10 }
 0x24e   :  { %2884 = vmatprep.subr.bf16.mxu1 %v4357_v12  ;;  %2856 = vmatpush1.bf16.msra.mxu0 %v4394_v18  ;;  %v4439_v18 = vld [vmem:[%s5614_s7 + $0x2a8] ss:$16 sps:$4 sm:$0xff]  }
 0x24f   :  { %2857 = vmatprep.subr.bf16.mxu0 %v4402_v56  ;;  %v4447_v56 = vld [vmem:[%s5614_s7 + $0x2cc] ss:$16 sps:$4 sm:$0xff]  }
 0x251   :  { %2885 = vmatpush1.bf16.msra.mxu1 %v4355_v14 }
 0x252   :  { %2886 = vmatprep.subr.bf16.mxu1 %v4363_v30  ;;  %2858 = vmatpush1.bf16.msra.mxu0 %v4400_v58  ;;  %v4445_v58 = vld [vmem:[%s5614_s7 + $0x2c8] ss:$16 sps:$4 sm:$0xff]  }
 0x253   :  { %3233 = vmatprep.subr.bf16.mxu0 %v4408_v59  ;;  %v4453_v59 = vld [vmem:[%s5614_s7 + $0x2ec] ss:$16 sps:$4 sm:$0xff]  }
 0x255   :  { %2887 = vmatpush1.bf16.msra.mxu1 %v4361_v17 }
 0x256   :  { %2888 = vmatprep.subr.bf16.mxu1 %v4369_v20  ;;  %v4406_v20 = vld [vmem:[%s5614_s7 + $0x200] ss:$16 sps:$4 sm:$0xff]  }
 0x259   :  { %2889 = vmatpush1.bf16.msra.mxu1 %v4367_v22  ;;  %v4414_v22 = vld [vmem:[%s5614_s7 + $0x224] ss:$16 sps:$4 sm:$0xff]  }
 0x25a   :  { %2890 = vmatprep.subr.bf16.mxu1 %v4375_v25  ;;  %v4412_v25 = vld [vmem:[%s5614_s7 + $0x220] ss:$16 sps:$4 sm:$0xff]  }
 0x25d   :  { %2891 = vmatpush1.bf16.msra.mxu1 %v4373_v34  ;;  %v4420_v34 = vld [vmem:[%s5614_s7 + $0x244] ss:$16 sps:$4 sm:$0xff]  }
 0x25e   :  { %2892 = vmatprep.subr.bf16.mxu1 %v4381_v32  ;;  %v4418_v32 = vld [vmem:[%s5614_s7 + $0x240] ss:$16 sps:$4 sm:$0xff]  }
 0x261   :  { %2893 = vmatpush1.bf16.msra.mxu1 %v4379_v35  ;;  %v4426_v35 = vld [vmem:[%s5614_s7 + $0x264] ss:$16 sps:$4 sm:$0xff]  }
 0x262   :  { %2894 = vmatprep.subr.bf16.mxu1 %v4387_v38  ;;  %v4424_v38 = vld [vmem:[%s5614_s7 + $0x260] ss:$16 sps:$4 sm:$0xff]  }
 0x265   :  { %2895 = vmatpush1.bf16.msra.mxu1 %v4385_v42  ;;  %v4432_v42 = vld [vmem:[%s5614_s7 + $0x284] ss:$16 sps:$4 sm:$0xff]  }
 0x266   :  { %2896 = vmatprep.subr.bf16.mxu1 %v4393_v46  ;;  %v4430_v46 = vld [vmem:[%s5614_s7 + $0x280] ss:$16 sps:$4 sm:$0xff]  }
 0x269   :  { %2897 = vmatpush1.bf16.msra.mxu1 %v4391_v50  ;;  %v4438_v50 = vld [vmem:[%s5614_s7 + $0x2a4] ss:$16 sps:$4 sm:$0xff]  }
 0x26a   :  { %2898 = vmatprep.subr.bf16.mxu1 %v4399_v54  ;;  %v4436_v54 = vld [vmem:[%s5614_s7 + $0x2a0] ss:$16 sps:$4 sm:$0xff]  }
 0x26d   :  { %2899 = vmatpush1.bf16.msra.mxu1 %v4397_v27  ;;  %v4444_v27 = vld [vmem:[%s5614_s7 + $0x2c4] ss:$16 sps:$4 sm:$0xff]  }
 0x26e   :  { %2900 = vmatprep.subr.bf16.mxu1 %v4405_v63  ;;  %v4442_v63 = vld [vmem:[%s5614_s7 + $0x2c0] ss:$16 sps:$4 sm:$0xff]  }
 0x271   :  { %2901 = vmatpush1.bf16.msra.mxu1 %v4403_v21  ;;  %v4450_v21 = vld [vmem:[%s5614_s7 + $0x2e4] ss:$16 sps:$4 sm:$0xff]  }
 0x272   :  { %3276 = vmatprep.subr.bf16.mxu1 %v4411_v61  ;;  %v4448_v61 = vld [vmem:[%s5614_s7 + $0x2e0] ss:$16 sps:$4 sm:$0xff]  }
 0x2e7   :  { %v2123_v39 = vpop.f32.mrb[72].mxu0 }
 0x2e8   :  { %v2143_v41 = vadd.f32 %v2136_v48, %v2123_v39  ;;  %v2125_v43 = vpop.f32.mrb[73].mxu0  ;;  %v4457_v39 = vld [vmem:[%s5614_s7 + $0x308] ss:$16 sps:$4 sm:$0xff]  }
 0x2e9   :  { %v2144_v45 = vadd.f32 %v2140_v26, %v2125_v43  ;;  %v2127_v47 = vpop.f32.mrb[74].mxu0  ;;  %v4465_v43 = vld [vmem:[%s5614_s7 + $0x32c] ss:$16 sps:$4 sm:$0xff]  }
 0x2ea   :  { %v2145_v51 = vadd.f32 %v2136_v48, %v2127_v47  ;;  %v2129_v53 = vpop.f32.mrb[75].mxu0  ;;  %v2147_v57 = vmax.f32 %v2143_v41, 0.0  ;;  %v4462_v41 = vld [vmem:[%s5614_s7 + $0x324] ss:$16 sps:$4 sm:$0xff]   ;;  %v4463_v47 = vld [vmem:[%s5614_s7 + $0x328] ss:$16 sps:$4 sm:$0xff]  }
 0x2eb   :  { %v2146_v55 = vadd.f32 %v2140_v26, %v2129_v53  ;;  %v2148_v60 = vmax.f32 %v2144_v45, 0.0  ;;  %v4460_v45 = vld [vmem:[%s5614_s7 + $0x320] ss:$16 sps:$4 sm:$0xff]   ;;  %v4471_v53 = vld [vmem:[%s5614_s7 + $0x34c] ss:$16 sps:$4 sm:$0xff]  }
 0x2ec   :  { %v2149_v24 = vmax.f32 %v2145_v51, 0.0  ;;  %v4468_v51 = vld [vmem:[%s5614_s7 + $0x344] ss:$16 sps:$4 sm:$0xff]  }
 0x2ed   :  { %v2150_v7 = vmax.f32 %v2146_v55, 0.0  ;;  %v4466_v55 = vld [vmem:[%s5614_s7 + $0x340] ss:$16 sps:$4 sm:$0xff]  }
 0x2ee   :  { %v5386_v4 = vpack.c.bf16 %v2149_v24, %v2147_v57  ;;  %v4469_v57 = vld [vmem:[%s5614_s7 + $0x348] ss:$16 sps:$4 sm:$0xff]   ;;  %v4474_v24 = vld [vmem:[%s5614_s7 + $0x364] ss:$16 sps:$4 sm:$0xff]  }
 0x2ef   :  { %v2152_v5 = vpack.c.bf16 %v2150_v7, %v2148_v60  ;;  %v4477_v60 = vld [vmem:[%s5614_s7 + $0x36c] ss:$16 sps:$4 sm:$0xff]   ;;  %v4472_v7 = vld [vmem:[%s5614_s7 + $0x360] ss:$16 sps:$4 sm:$0xff]  }
 0x307   :  { %v2353_v3 = vpop.f32.mrb[64].mxu1 }
 0x308   :  { %v2366_v6 = vadd.f32 %v2353_v3, %v2136_v48  ;;  %v2355_v28 = vpop.f32.mrb[65].mxu1  ;;  %v4480_v3 = vld [vmem:[%s5614_s7 + $0x384] ss:$16 sps:$4 sm:$0xff]  }
 0x309   :  { %v2367_v9 = vadd.f32 %v2355_v28, %v2140_v26  ;;  %v2357_v10 = vpop.f32.mrb[66].mxu1  ;;  %v4478_v28 = vld [vmem:[%s5614_s7 + $0x380] ss:$16 sps:$4 sm:$0xff]  }
 0x30a   :  { %v2368_v11 = vadd.f32 %v2357_v10, %v2136_v48  ;;  %v2359_v12 = vpop.f32.mrb[67].mxu1  ;;  %v2370_v14 = vmax.f32 %v2366_v6, 0.0  ;;  %v4459_v48 = vld [vmem:[%s5614_s7 + $0x30c] ss:$16 sps:$4 sm:$0xff]   ;;  %v4486_v10 = vld [vmem:[%s5614_s7 + $0x3a4] ss:$16 sps:$4 sm:$0xff]  }
 0x30b   :  { %v2369_v13 = vadd.f32 %v2359_v12, %v2140_v26  ;;  %v2371_v16 = vmax.f32 %v2367_v9, 0.0  ;;  %v4454_v26 = vld [vmem:[%s5614_s7 + $0x300] ss:$16 sps:$4 sm:$0xff]   ;;  %v4483_v6 = vld [vmem:[%s5614_s7 + $0x38c] ss:$16 sps:$4 sm:$0xff]  }
 0x30c   :  { %v2372_v15 = vmax.f32 %v2368_v11, 0.0  ;;  %v4481_v9 = vld [vmem:[%s5614_s7 + $0x388] ss:$16 sps:$4 sm:$0xff]   ;;  %v4489_v11 = vld [vmem:[%s5614_s7 + $0x3ac] ss:$16 sps:$4 sm:$0xff]  }
 0x30d   :  { %v2373_v17 = vmax.f32 %v2369_v13, 0.0  ;;  %v4484_v12 = vld [vmem:[%s5614_s7 + $0x3a0] ss:$16 sps:$4 sm:$0xff]   ;;  %v4487_v13 = vld [vmem:[%s5614_s7 + $0x3a8] ss:$16 sps:$4 sm:$0xff]  }
 0x30e   :  { %v2374_v30 = vpack.c.bf16 %v2372_v15, %v2370_v14  ;;  %v4492_v14 = vld [vmem:[%s5614_s7 + $0x3c4] ss:$16 sps:$4 sm:$0xff]   ;;  %v4495_v15 = vld [vmem:[%s5614_s7 + $0x3cc] ss:$16 sps:$4 sm:$0xff]  }
 0x30f   :  { %v2375_v19 = vpack.c.bf16 %v2373_v17, %v2371_v16  ;;  %v4490_v16 = vld [vmem:[%s5614_s7 + $0x3c0] ss:$16 sps:$4 sm:$0xff]   ;;  %v4493_v17 = vld [vmem:[%s5614_s7 + $0x3c8] ss:$16 sps:$4 sm:$0xff]  }
 0x311   :  { %2859 = vmatprep.mubr.bf16.mxu0 %v2375_v19  ;;  %2902 = vmatprep.mubr.bf16.mxu1 %v2375_v19  ;;  %v4501_v19 = vld [vmem:[%s5614_s7 + $0x3ec] ss:$16 sps:$4 sm:$0xff]  }
 0x312   :  { %2860 = vmatmul.mubr.bf16.vlgmr.msra.gmra.mrb[76].mxu0 %v2374_v30  ;;  %2903 = vmatmul.mubr.bf16.vlgmr.msra.gmra.mrb[68].mxu1 %v2374_v30  ;;  %v4498_v30 = vld [vmem:[%s5614_s7 + $0x3e4] ss:$16 sps:$4 sm:$0xff]  }
 0x313   :  { %3234 = vmatpush1.bf16.msra.mxu0 %v4406_v20  ;;  %3277 = vmatpush1.bf16.msra.mxu1 %v4409_v23  ;;  %v4496_v20 = vld [vmem:[%s5614_s7 + $0x3e0] ss:$16 sps:$4 sm:$0xff]   ;;  %v4499_v23 = vld [vmem:[%s5614_s7 + $0x3e8] ss:$16 sps:$4 sm:$0xff]  }
 0x314   :  { %3265 = vmatprep.mubr.bf16.mxu0 %v2152_v5  ;;  %3308 = vmatprep.mubr.bf16.mxu1 %v2152_v5  ;;  %v4475_v5 = vld [vmem:[%s5614_s7 + $0x368] ss:$16 sps:$4 sm:$0xff]  }
 0x315   :  { %3235 = vmatprep.subr.bf16.mxu0 %v4414_v22  ;;  %3278 = vmatprep.subr.bf16.mxu1 %v4417_v31  ;;  %v3330_v22 = vsub.s32 2, %v5375_v49  ;;  %v2506_v31 = vld [vmem:[%s5617_s8] sm:$0xf] }
 0x317   :  { %3236 = vmatpush1.bf16.msra.mxu0 %v4412_v25  ;;  %3279 = vmatpush1.bf16.msra.mxu1 %v4415_v33  ;;  %v3334_v25 = vsub.s32 3, %v5375_v49  ;;  %v3323_v33 = vrot.slane %v2506_v31, %v2135_v37 }
 0x318   :  { %3237 = vmatprep.subr.bf16.mxu0 %v4420_v34  ;;  %3280 = vmatprep.subr.bf16.mxu1 %v4423_v8  ;;  %v3331_v34 = vrot.slane %v2506_v31, %v3330_v22  ;;  %v3327_v8 = vrot.slane %v2506_v31, %v2139_v2 }
 0x31b   :  { %3238 = vmatpush1.bf16.msra.mxu0 %v4418_v32  ;;  %3281 = vmatpush1.bf16.msra.mxu1 %v4421_v0  ;;  %v3335_v32 = vrot.slane %v2506_v31, %v3334_v25 }
 0x31c   :  { %3239 = vmatprep.subr.bf16.mxu0 %v4426_v35  ;;  %3282 = vmatprep.subr.bf16.mxu1 %v4429_v36 }
 0x31f   :  { %3240 = vmatpush1.bf16.msra.mxu0 %v4424_v38  ;;  %3283 = vmatpush1.bf16.msra.mxu1 %v4427_v40 }
 0x320   :  { %3241 = vmatprep.subr.bf16.mxu0 %v4432_v42  ;;  %3284 = vmatprep.subr.bf16.mxu1 %v4435_v44 }
 0x323   :  { %3242 = vmatpush1.bf16.msra.mxu0 %v4430_v46  ;;  %3285 = vmatpush1.bf16.msra.mxu1 %v4433_v29 }
 0x324   :  { %3243 = vmatprep.subr.bf16.mxu0 %v4438_v50  ;;  %3286 = vmatprep.subr.bf16.mxu1 %v4441_v52 }
 0x327   :  { %3244 = vmatpush1.bf16.msra.mxu0 %v4436_v54  ;;  %3287 = vmatpush1.bf16.msra.mxu1 %v4439_v18 }
 0x328   :  { %3245 = vmatprep.subr.bf16.mxu0 %v4444_v27  ;;  %3288 = vmatprep.subr.bf16.mxu1 %v4447_v56 }
 0x32b   :  { %3246 = vmatpush1.bf16.msra.mxu0 %v4442_v63  ;;  %3289 = vmatpush1.bf16.msra.mxu1 %v4445_v58 }
 0x32c   :  { %3247 = vmatprep.subr.bf16.mxu0 %v4450_v21  ;;  %3290 = vmatprep.subr.bf16.mxu1 %v4453_v59 }
 0x32f   :  { %3248 = vmatpush1.bf16.msra.mxu0 %v4448_v61  ;;  %3291 = vmatpush1.bf16.msra.mxu1 %v4451_v62 }
 0x330   :  { %3249 = vmatprep.subr.bf16.mxu0 %v4456_v1  ;;  %3292 = vmatprep.subr.bf16.mxu1 %v4459_v48 }
 0x333   :  { %3250 = vmatpush1.bf16.msra.mxu0 %v4454_v26  ;;  %3293 = vmatpush1.bf16.msra.mxu1 %v4457_v39 }
 0x334   :  { %3251 = vmatprep.subr.bf16.mxu0 %v4462_v41  ;;  %3294 = vmatprep.subr.bf16.mxu1 %v4465_v43 }
 0x337   :  { %3252 = vmatpush1.bf16.msra.mxu0 %v4460_v45  ;;  %3295 = vmatpush1.bf16.msra.mxu1 %v4463_v47 }
 0x338   :  { %3253 = vmatprep.subr.bf16.mxu0 %v4468_v51  ;;  %3296 = vmatprep.subr.bf16.mxu1 %v4471_v53 }
 0x33b   :  { %3254 = vmatpush1.bf16.msra.mxu0 %v4466_v55  ;;  %3297 = vmatpush1.bf16.msra.mxu1 %v4469_v57 }
 0x33c   :  { %3255 = vmatprep.subr.bf16.mxu0 %v4474_v24  ;;  %3298 = vmatprep.subr.bf16.mxu1 %v4477_v60 }
 0x33f   :  { %3256 = vmatpush1.bf16.msra.mxu0 %v4472_v7  ;;  %3299 = vmatpush1.bf16.msra.mxu1 %v4475_v5 }
 0x340   :  { %3257 = vmatprep.subr.bf16.mxu0 %v4480_v3  ;;  %3300 = vmatprep.subr.bf16.mxu1 %v4483_v6 }
 0x343   :  { %3258 = vmatpush1.bf16.msra.mxu0 %v4478_v28  ;;  %3301 = vmatpush1.bf16.msra.mxu1 %v4481_v9 }
 0x344   :  { %3259 = vmatprep.subr.bf16.mxu0 %v4486_v10  ;;  %3302 = vmatprep.subr.bf16.mxu1 %v4489_v11 }
 0x347   :  { %3260 = vmatpush1.bf16.msra.mxu0 %v4484_v12  ;;  %3303 = vmatpush1.bf16.msra.mxu1 %v4487_v13 }
 0x348   :  { %3261 = vmatprep.subr.bf16.mxu0 %v4492_v14  ;;  %3304 = vmatprep.subr.bf16.mxu1 %v4495_v15 }
 0x34b   :  { %3262 = vmatpush1.bf16.msra.mxu0 %v4490_v16  ;;  %3305 = vmatpush1.bf16.msra.mxu1 %v4493_v17 }
 0x34c   :  { %3263 = vmatprep.subr.bf16.mxu0 %v4498_v30  ;;  %3306 = vmatprep.subr.bf16.mxu1 %v4501_v19 }
 0x34f   :  { %3264 = vmatpush1.bf16.msra.mxu0 %v4496_v20  ;;  %3307 = vmatpush1.bf16.msra.mxu1 %v4499_v23 }
 0x352   :  { %3266 = vmatmul.mubr.bf16.vlgmr.msra.gmra.mrb[76].mxu0 %v5386_v4  ;;  %3309 = vmatmul.mubr.bf16.vlgmr.msra.gmra.mrb[68].mxu1 %v5386_v4 }
 0x425   :  { %v3267_v0 = vpop.f32.mrb[76].mxu0  ;;  %v3310_v35 = vpop.f32.mrb[68].mxu1 }
 0x426   :  { %v3340_v36 = vadd.f32 %v3323_v33, %v3267_v0  ;;  %v3342_v4 = vadd.f32 %v3331_v34, %v3310_v35  ;;  %v3269_v38 = vpop.f32.mrb[77].mxu0  ;;  %v3312_v40 = vpop.f32.mrb[69].mxu1 }
 0x427   :  { %v3341_v42 = vadd.f32 %v3327_v8, %v3269_v38  ;;  %v3343_v44 = vadd.f32 %v3335_v32, %v3312_v40  ;;  %v3271_v46 = vpop.f32.mrb[78].mxu0  ;;  %v3314_v29 = vpop.f32.mrb[70].mxu1 }
 0x428   :  { %v3348_v50 = vmax.f32 %v3340_v36, 0.0  ;;  %v3350_v52 = vmax.f32 %v3342_v4, 0.0  ;;  %v3344_v54 = vadd.f32 %v3323_v33, %v3271_v46  ;;  %v3346_v18 = vadd.f32 %v3331_v34, %v3314_v29  ;;  %v3273_v37 = vpop.f32.mrb[79].mxu0  ;;  %v3316_v27 = vpop.f32.mrb[71].mxu1 }
 0x429   :  { %v3349_v56 = vmax.f32 %v3341_v42, 0.0  ;;  %v3351_v49 = vmax.f32 %v3343_v44, 0.0  ;;  %v3345_v2 = vadd.f32 %v3327_v8, %v3273_v37  ;;  %v3347_v63 = vadd.f32 %v3335_v32, %v3316_v27 }
 0x42a   :  { %3356 = vst [vmem:[%s5618_s9] sm:$0xff] %v3348_v50  ;;  %3358 = vst [vmem:[%s5618_s9 + $0x10] sm:$0xff] %v3350_v52  ;;  %v3352_v58 = vmax.f32 %v3344_v54, 0.0  ;;  %v3354_v21 = vmax.f32 %v3346_v18, 0.0 }
 0x42b   :  { %3357 = vst [vmem:[%s5618_s9 + $0x8] sm:$0xff] %v3349_v56  ;;  %3359 = vst [vmem:[%s5618_s9 + $0x18] sm:$0xff] %v3351_v49  ;;  %v3353_v59 = vmax.f32 %v3345_v2, 0.0  ;;  %v3355_v61 = vmax.f32 %v3347_v63, 0.0 }
 0x42c   :  { %3360 = vst [vmem:[%s5618_s9 + $0x20] sm:$0xff] %v3352_v58  ;;  %3362 = vst [vmem:[%s5618_s9 + $0x30] sm:$0xff] %v3354_v21 }
 0x42d   :  { %3361 = vst [vmem:[%s5618_s9 + $0x28] sm:$0xff] %v3353_v59  ;;  %3363 = vst [vmem:[%s5618_s9 + $0x38] sm:$0xff] %v3355_v61 }

</bundles_post_ra>
